<compile_context>
chip_gen: v6e
topology: v6e:2x2x1
jax: 0.10.0
libtpu: 0.0.40
codegen_flags: <defaults>
</compile_context>

<pallas_src>
import functools

import jax
import jax.numpy as jnp
from jax import lax
from jax.experimental import pallas as pl
from jax.experimental.pallas import tpu as pltpu


def _round_up(x, m):
    return (x + m - 1) // m * m


# ---------------------------------------------------------------------------
# Pallas kernel 1: full-K matmul + bias + optional ReLU (linear projections;
# K is the feature dim, small enough that the reduction stays in one MXU call).
# ---------------------------------------------------------------------------
def _matmul_kernel(x_ref, w_ref, b_ref, o_ref, *, activation):
    r = jnp.dot(x_ref[...], w_ref[...], preferred_element_type=jnp.float32)
    r = r + b_ref[...]
    if activation == "relu":
        r = jnp.maximum(r, 0.0)
    o_ref[...] = r.astype(o_ref.dtype)


def matmul_bias_act(x, w, b, activation=None, out_dtype=jnp.bfloat16,
                    tm=512, tn=256):
    """y = act(x @ w + b).  x:(M,K)  w:(K,N)  b:(N,) -> (M,N) in out_dtype."""
    M, K = x.shape
    Kw, N = w.shape
    assert K == Kw

    x = x.astype(jnp.bfloat16)
    w = w.astype(jnp.bfloat16)
    b2 = b.astype(jnp.float32).reshape(1, N)

    tm_eff = min(tm, _round_up(M, 16))
    if N % 128 == 0:
        tn_eff = min(tn, N)
        while N % tn_eff:
            tn_eff //= 2
    else:
        tn_eff = N               # small N: full-dim (lane) block, no padding

    out = pl.pallas_call(
        functools.partial(_matmul_kernel, activation=activation),
        out_shape=jax.ShapeDtypeStruct((M, N), out_dtype),
        grid_spec=pltpu.PrefetchScalarGridSpec(
            num_scalar_prefetch=0,
            grid=(pl.cdiv(M, tm_eff), N // tn_eff),
            in_specs=[
                pl.BlockSpec((tm_eff, K), lambda i, j: (i, 0)),
                pl.BlockSpec((K, tn_eff), lambda i, j: (0, j)),
                pl.BlockSpec((1, tn_eff), lambda i, j: (0, j)),
            ],
            out_specs=pl.BlockSpec((tm_eff, tn_eff), lambda i, j: (i, j)),
        ),
        compiler_params=pltpu.CompilerParams(
            dimension_semantics=("parallel", "parallel")),
    )(x, w, b2)
    return out


# ---------------------------------------------------------------------------
# Pallas kernel 2: fused K/V projection.  One pass over the camera tokens,
# two lane-dense outputs -> no kv[..., :Cf] / kv[..., Cf:] HBM slice copies.
# ---------------------------------------------------------------------------
def _kv_proj_kernel(x_ref, wk_ref, bk_ref, wv_ref, bv_ref, k_ref, v_ref):
    x = x_ref[...]
    k = jnp.dot(x, wk_ref[...], preferred_element_type=jnp.float32) + bk_ref[...]
    v = jnp.dot(x, wv_ref[...], preferred_element_type=jnp.float32) + bv_ref[...]
    k_ref[...] = k.astype(k_ref.dtype)
    v_ref[...] = v.astype(v_ref.dtype)


def kv_projection(x, wk, bk, wv, bv, tm=512):
    M, K = x.shape
    _, N = wk.shape

    x = x.astype(jnp.bfloat16)
    wk = wk.astype(jnp.bfloat16)
    wv = wv.astype(jnp.bfloat16)
    bk2 = bk.astype(jnp.float32).reshape(1, N)
    bv2 = bv.astype(jnp.float32).reshape(1, N)

    tm_eff = min(tm, _round_up(M, 16))

    k_out, v_out = pl.pallas_call(
        _kv_proj_kernel,
        out_shape=(jax.ShapeDtypeStruct((M, N), jnp.bfloat16),
                   jax.ShapeDtypeStruct((M, N), jnp.bfloat16)),
        grid_spec=pltpu.PrefetchScalarGridSpec(
            num_scalar_prefetch=0,
            grid=(pl.cdiv(M, tm_eff),),
            in_specs=[
                pl.BlockSpec((tm_eff, K), lambda i: (i, 0)),
                pl.BlockSpec((K, N), lambda i: (0, 0)),
                pl.BlockSpec((1, N), lambda i: (0, 0)),
                pl.BlockSpec((K, N), lambda i: (0, 0)),
                pl.BlockSpec((1, N), lambda i: (0, 0)),
            ],
            out_specs=[
                pl.BlockSpec((tm_eff, N), lambda i: (i, 0)),
                pl.BlockSpec((tm_eff, N), lambda i: (i, 0)),
            ],
        ),
        compiler_params=pltpu.CompilerParams(
            dimension_semantics=("parallel",)),
    )(x, wk, bk2, wv, bv2)
    return k_out, v_out


# ---------------------------------------------------------------------------
# Pallas kernel 3: flash-style cross-view attention (online softmax) with the
# output projection fused into the last-kv-tile epilogue.
# grid = (B, Nq/tq, Nk/tk); m/l/acc live in VMEM scratch across the kv axis.
# ---------------------------------------------------------------------------
def _flash_attn_kernel(q_ref, k_ref, v_ref, wo_ref, bo_ref, o_ref,
                       m_sc, l_sc, acc_sc, *, nk_valid, tk, mask_keys):
    kv = pl.program_id(2)

    @pl.when(kv == 0)
    def _():
        m_sc[...] = jnp.full_like(m_sc, -jnp.inf)
        l_sc[...] = jnp.zeros_like(l_sc)
        acc_sc[...] = jnp.zeros_like(acc_sc)

    q = q_ref[0]                                                 # (tq, D) bf16
    k = k_ref[0]                                                 # (tk, D) bf16
    v = v_ref[0]                                                 # (tk, D) bf16
    # 1/sqrt(D) is folded into the q projection weights in the wrapper.
    s = lax.dot_general(q, k, (((1,), (1,)), ((), ())),
                        preferred_element_type=jnp.float32)      # (tq, tk) f32

    if mask_keys:   # only emitted when Nk was actually padded in the wrapper
        col = kv * tk + lax.broadcasted_iota(jnp.int32, s.shape, 1)
        s = jnp.where(col < nk_valid, s, -1e30)

    m_prev = m_sc[0]                                             # (tq, 1)
    m_new = jnp.maximum(m_prev, jnp.max(s, axis=-1, keepdims=True))
    alpha = jnp.exp(m_prev - m_new)
    p = jnp.exp(s - m_new)
    l_sc[0] = alpha * l_sc[0] + jnp.sum(p, axis=-1, keepdims=True)
    acc_sc[0] = alpha * acc_sc[0] + jnp.dot(
        p.astype(jnp.bfloat16), v, preferred_element_type=jnp.float32)
    m_sc[0] = m_new

    @pl.when(kv == pl.num_programs(2) - 1)
    def _():
        inv_l = pl.reciprocal(l_sc[0], approx=True)              # EUP slot
        attn = (acc_sc[0] * inv_l).astype(jnp.bfloat16)          # (tq, D)
        o = jnp.dot(attn, wo_ref[...], preferred_element_type=jnp.float32)
        o_ref[0] = (o + bo_ref[...]).astype(o_ref.dtype)


def cross_attention_proj(q, k, v, wo, bo, tq=256, tk=512):
    """attn(q,k,v) @ wo + bo.  q:(1 or B,Nq,D)  k,v:(B,Nk,D) -> (B,Nq,Co) bf16.

    A shape-(1,Nq,D) q is shared across the batch without materializing the
    broadcast (index_map pins the batch block to 0).  Scale pre-folded into q.
    """
    Bq, Nq, D = q.shape
    B, Nk, _ = k.shape
    Co = wo.shape[1]

    q = q.astype(jnp.bfloat16)
    k = k.astype(jnp.bfloat16)
    v = v.astype(jnp.bfloat16)
    wo = wo.astype(jnp.bfloat16)
    bo2 = bo.astype(jnp.float32).reshape(1, Co)

    tq_eff = min(tq, _round_up(Nq, 16))
    tk_eff = min(tk, _round_up(Nk, 16))
    Nkp = _round_up(Nk, tk_eff)
    mask_keys = Nkp != Nk
    if mask_keys:
        # zero padding keeps 0*0 in the PV accumulation; in-kernel mask kills
        # the padded columns in the softmax.
        k = jnp.pad(k, ((0, 0), (0, Nkp - Nk), (0, 0)))
        v = jnp.pad(v, ((0, 0), (0, Nkp - Nk), (0, 0)))

    if Bq == 1:
        q_map = lambda b, qi, ki: (0, qi, 0)
    else:
        q_map = lambda b, qi, ki: (b, qi, 0)

    out = pl.pallas_call(
        functools.partial(_flash_attn_kernel, nk_valid=Nk, tk=tk_eff,
                          mask_keys=mask_keys),
        out_shape=jax.ShapeDtypeStruct((B, Nq, Co), jnp.bfloat16),
        grid_spec=pltpu.PrefetchScalarGridSpec(
            num_scalar_prefetch=0,
            grid=(B, pl.cdiv(Nq, tq_eff), Nkp // tk_eff),
            in_specs=[
                pl.BlockSpec((1, tq_eff, D), q_map),
                pl.BlockSpec((1, tk_eff, D), lambda b, qi, ki: (b, ki, 0)),
                pl.BlockSpec((1, tk_eff, D), lambda b, qi, ki: (b, ki, 0)),
                pl.BlockSpec((D, Co), lambda b, qi, ki: (0, 0)),
                pl.BlockSpec((1, Co), lambda b, qi, ki: (0, 0)),
            ],
            out_specs=pl.BlockSpec((1, tq_eff, Co),
                                   lambda b, qi, ki: (b, qi, 0)),
            scratch_shapes=[
                pltpu.VMEM((1, tq_eff, 1), jnp.float32),   # running max
                pltpu.VMEM((1, tq_eff, 1), jnp.float32),   # running sum
                pltpu.VMEM((1, tq_eff, D), jnp.float32),   # output accumulator
            ],
        ),
        compiler_params=pltpu.CompilerParams(
            dimension_semantics=("parallel", "parallel", "arbitrary")),
    )(q, k, v, wo, bo2)
    return out


# ---------------------------------------------------------------------------
# Pallas kernel 4: fused decoder 1x1 conv (+ReLU) + seg head, one HBM pass.
# logits = relu(x @ w1 + b1) @ w2 + b2 computed at BEV resolution, bf16 out.
# ---------------------------------------------------------------------------
def _dec_head_kernel(x_ref, w1_ref, b1_ref, w2_ref, b2_ref, o_ref):
    h = jnp.dot(x_ref[...], w1_ref[...], preferred_element_type=jnp.float32)
    h = jnp.maximum(h + b1_ref[...], 0.0)
    o = jnp.dot(h.astype(jnp.bfloat16), w2_ref[...],
                preferred_element_type=jnp.float32)
    o_ref[...] = (o + b2_ref[...]).astype(o_ref.dtype)


def decoder_seg_head(x, w1, b1, w2, b2, tm=256, out_dtype=jnp.bfloat16):
    M, K = x.shape
    _, S = w1.shape
    _, C = w2.shape

    x = x.astype(jnp.bfloat16)
    w1 = w1.astype(jnp.bfloat16)
    w2 = w2.astype(jnp.bfloat16)
    b1 = b1.astype(jnp.float32).reshape(1, S)
    b2 = b2.astype(jnp.float32).reshape(1, C)

    tm_eff = min(tm, _round_up(M, 16))

    # TODO(synk): n_class-wide output is lane-sparse (masked vst); negligible
    # at this size, but a transposed (C, M) logits layout would be lane-dense.
    out = pl.pallas_call(
        _dec_head_kernel,
        out_shape=jax.ShapeDtypeStruct((M, C), out_dtype),
        grid_spec=pltpu.PrefetchScalarGridSpec(
            num_scalar_prefetch=0,
            grid=(pl.cdiv(M, tm_eff),),
            in_specs=[
                pl.BlockSpec((tm_eff, K), lambda i: (i, 0)),
                pl.BlockSpec((K, S), lambda i: (0, 0)),
                pl.BlockSpec((1, S), lambda i: (0, 0)),
                pl.BlockSpec((S, C), lambda i: (0, 0)),
                pl.BlockSpec((1, C), lambda i: (0, 0)),
            ],
            out_specs=pl.BlockSpec((tm_eff, C), lambda i: (i, 0)),
        ),
        compiler_params=pltpu.CompilerParams(
            dimension_semantics=("parallel",)),
    )(x, w1, b1, w2, b2)
    return out


# ---------------------------------------------------------------------------
# Encoder stand-in (ResnetEncoder stem): 3x3 stride-2 conv + ReLU.
# ---------------------------------------------------------------------------
def encoder_conv(x_nhwc, w, b):
    # TODO(synk): the strided 3x3 patch extraction stays on XLA's native conv
    # (avoids the im2col HBM blowup); a halo-DMA Pallas conv is not worthwhile
    # for a 4-channel input.
    y = lax.conv_general_dilated(
        x_nhwc.astype(jnp.bfloat16), w.astype(jnp.bfloat16),
        window_strides=(2, 2), padding=((1, 1), (1, 1)),
        dimension_numbers=("NHWC", "HWIO", "NHWC"),
        preferred_element_type=jnp.float32)
    y = jnp.maximum(y + b.astype(jnp.float32), 0.0)
    return y.astype(jnp.bfloat16)


# ---------------------------------------------------------------------------
# Parameters & forward pass
# ---------------------------------------------------------------------------
def init_params(key, c_in, c_feat, hb, wb, seg_dim, n_class):
    ks = jax.random.split(key, 9)

    def w(k, shape, scale=0.05):
        return jax.random.normal(k, shape, jnp.float32) * scale

    return {
        # encoder: 3x3 conv, stride 2 (HWIO)
        "enc_w": w(ks[0], (3, 3, c_in, c_feat), 0.1),
        "enc_b": jnp.zeros((c_feat,), jnp.float32),
        # cvm: learned BEV query embedding + q/k/v/out projections
        "bev_embed": w(ks[1], (hb * wb, c_feat), 0.02),
        "wq": w(ks[2], (c_feat, c_feat)), "bq": jnp.zeros((c_feat,), jnp.float32),
        "wk": w(ks[3], (c_feat, c_feat)), "bk": jnp.zeros((c_feat,), jnp.float32),
        "wv": w(ks[4], (c_feat, c_feat)), "bv": jnp.zeros((c_feat,), jnp.float32),
        "wo": w(ks[5], (c_feat, c_feat)), "bo": jnp.zeros((c_feat,), jnp.float32),
        # decoder 1x1 conv
        "dec_w": w(ks[6], (c_feat, seg_dim)), "dec_b": jnp.zeros((seg_dim,), jnp.float32),
        # seg head (target='dynamic')
        "head_w": w(ks[7], (seg_dim, n_class)), "head_b": jnp.zeros((n_class,), jnp.float32),
    }


def cross_view_transformer_forward(x, params):
    """x: (b, l, m, c, h, w)  NCHW-per-camera, as in the PyTorch module."""
    b, l, m, c, h, w = x.shape
    Cf = params["wq"].shape[0]

    # ---- encoder (ResnetEncoder stand-in): 3x3 s2 conv + ReLU ----
    xe = jnp.transpose(x.reshape(b * l * m, c, h, w), (0, 2, 3, 1))  # NCHW->NHWC
    feat = encoder_conv(xe, params["enc_w"], params["enc_b"])        # (blm,Ho,Wo,Cf)
    Ho, Wo = feat.shape[1], feat.shape[2]
    BL = b * l
    Nk = m * Ho * Wo
    feat = feat.reshape(BL * Nk, Cf)                                 # camera tokens

    # ---- cvm (CrossViewModule stand-in): BEV queries attend over cameras ----
    Hb, Wb = Ho, Wo
    scale = 1.0 / (Cf ** 0.5)
    # project the (Hb*Wb, Cf) BEV embedding ONCE; the softmax 1/sqrt(D) scale
    # is folded into the q projection; the per-sample broadcast is virtual
    # (handled by the attention q BlockSpec, never written to HBM).
    q1 = matmul_bias_act(params["bev_embed"],
                         params["wq"] * scale, params["bq"] * scale)
    q1 = q1.reshape(1, Hb * Wb, Cf)

    # fused K/V projection: one pass over `feat`, two lane-dense outputs
    # (no last-dim slices through HBM).
    k_, v_ = kv_projection(feat, params["wk"], params["bk"],
                           params["wv"], params["bv"])
    k_ = k_.reshape(BL, Nk, Cf)
    v_ = v_.reshape(BL, Nk, Cf)

    # flash attention with wo/bo fused into the finalize epilogue.
    bev = cross_attention_proj(q1, k_, v_, params["wo"], params["bo"])
    bev = bev.reshape(BL * Hb * Wb, Cf)

    # ---- decoder + seg head (NaiveDecoder + BevSegHead stand-ins) ----
    # Pointwise convs commute with nearest upsample: run the 1x1 decoder conv
    # + ReLU and the class head at BEV resolution (fused in one Pallas kernel),
    # then upsample only the n_class logits.
    # TODO(synk): NaiveDecoder uses ConvTranspose2d; approximated by pointwise
    #             conv + nearest x2 upsample (same output resolution).
    logits = decoder_seg_head(bev, params["dec_w"], params["dec_b"],
                              params["head_w"], params["head_b"])
    n_class = logits.shape[-1]
    logits = logits.reshape(BL, Hb, Wb, n_class)
    logits = jnp.repeat(jnp.repeat(logits, 2, axis=1), 2, axis=2)    # x2 nearest
    Hd, Wd = logits.shape[1], logits.shape[2]
    seg = logits.reshape(b, l, Hd, Wd, n_class)
    seg = jnp.transpose(seg, (0, 1, 4, 2, 3))       # '(b l) c h w -> b l c h w'
    return {"dynamic_seg": seg}


if __name__ == "__main__":
    b, l, m, c, h, w = 2, 2, 2, 4, 16, 16
    # Cf = 128 keeps every matmul / attention output lane-dense (full vreg).
    c_feat, seg_dim, n_class = 128, 128, 2

    key = jax.random.PRNGKey(0)
    kx, kp = jax.random.split(key)
    x = jax.random.normal(kx, (b, l, m, c, h, w), jnp.float32)
    params = init_params(kp, c, c_feat, h // 2, w // 2, seg_dim, n_class)

    fwd = jax.jit(cross_view_transformer_forward)
    out = fwd(x, params)
    jax.block_until_ready(out)

    assert out["dynamic_seg"].shape == (b, l, n_class, h, w)
    assert bool(jnp.all(jnp.isfinite(out["dynamic_seg"].astype(jnp.float32))))
    print("KERNEL_OK")
</pallas_src>

<mosaic_0001>
module attributes {stable_mosaic.version = 11 : i64} {
  func.func @_kv_proj_kernel(%arg0: i32, %arg1: memref<512x128xbf16, #tpu.memory_space<vmem>>, %arg2: memref<128x128xbf16, #tpu.memory_space<vmem>>, %arg3: memref<1x128xf32, #tpu.memory_space<vmem>>, %arg4: memref<128x128xbf16, #tpu.memory_space<vmem>>, %arg5: memref<1x128xf32, #tpu.memory_space<vmem>>, %arg6: memref<512x128xbf16, #tpu.memory_space<vmem>>, %arg7: memref<512x128xbf16, #tpu.memory_space<vmem>>) attributes {dimension_semantics = [#tpu.dimension_semantics<parallel>], iteration_bounds = array<i64: 1>, scalar_prefetch = 0 : i64, scratch_operands = 0 : i64, tpu.core_type = #tpu.core_type<tc>, window_params = [{transform_indices = @transform_0, window_bounds = array<i64: 512, 128>}, {pipeline_mode = #tpu.pipeline_mode<synchronous>, transform_indices = @transform_1, window_bounds = array<i64: 128, 128>}, {pipeline_mode = #tpu.pipeline_mode<synchronous>, transform_indices = @transform_2, window_bounds = array<i64: 1, 128>}, {pipeline_mode = #tpu.pipeline_mode<synchronous>, transform_indices = @transform_3, window_bounds = array<i64: 128, 128>}, {pipeline_mode = #tpu.pipeline_mode<synchronous>, transform_indices = @transform_4, window_bounds = array<i64: 1, 128>}, {transform_indices = @transform_5, window_bounds = array<i64: 512, 128>}, {transform_indices = @transform_6, window_bounds = array<i64: 512, 128>}]} {
    %c0 = arith.constant 0 : index
    %c0_0 = arith.constant 0 : index
    %0 = vector.load %arg1[%c0, %c0_0] : memref<512x128xbf16, #tpu.memory_space<vmem>>, vector<512x128xbf16>
    %c0_1 = arith.constant 0 : index
    %c0_2 = arith.constant 0 : index
    %1 = vector.load %arg2[%c0_1, %c0_2] : memref<128x128xbf16, #tpu.memory_space<vmem>>, vector<128x128xbf16>
    %cst = arith.constant dense<0.000000e+00> : vector<512x128xf32>
    %2 = tpu.matmul %0, %1, %cst {dimension_numbers = #tpu.dot_dimension_numbers<[1], [0], [0], [1], [0, 0, 1, 1], [], []>} : vector<512x128xbf16>, vector<128x128xbf16>, vector<512x128xf32> -> vector<512x128xf32>
    %c0_3 = arith.constant 0 : index
    %c0_4 = arith.constant 0 : index
    %3 = vector.load %arg3[%c0_3, %c0_4] : memref<1x128xf32, #tpu.memory_space<vmem>>, vector<1x128xf32>
    %4 = vector.broadcast %3 : vector<1x128xf32> to vector<512x128xf32>
    %5 = arith.addf %2, %4 : vector<512x128xf32>
    %c0_5 = arith.constant 0 : index
    %c0_6 = arith.constant 0 : index
    %6 = vector.load %arg4[%c0_5, %c0_6] : memref<128x128xbf16, #tpu.memory_space<vmem>>, vector<128x128xbf16>
    %cst_7 = arith.constant dense<0.000000e+00> : vector<512x128xf32>
    %7 = tpu.matmul %0, %6, %cst_7 {dimension_numbers = #tpu.dot_dimension_numbers<[1], [0], [0], [1], [0, 0, 1, 1], [], []>} : vector<512x128xbf16>, vector<128x128xbf16>, vector<512x128xf32> -> vector<512x128xf32>
    %c0_8 = arith.constant 0 : index
    %c0_9 = arith.constant 0 : index
    %8 = vector.load %arg5[%c0_8, %c0_9] : memref<1x128xf32, #tpu.memory_space<vmem>>, vector<1x128xf32>
    %9 = vector.broadcast %8 : vector<1x128xf32> to vector<512x128xf32>
    %10 = arith.addf %7, %9 : vector<512x128xf32>
    %11 = arith.truncf %5 : vector<512x128xf32> to vector<512x128xbf16>
    %c0_10 = arith.constant 0 : index
    %c0_11 = arith.constant 0 : index
    %12 = vector.load %arg6[%c0_10, %c0_11] : memref<512x128xbf16, #tpu.memory_space<vmem>>, vector<512x128xbf16>
    tpu.vector_store %arg6[%c0_10, %c0_11], %11 {strides = array<i32>} : memref<512x128xbf16, #tpu.memory_space<vmem>>, vector<512x128xbf16>,
    %13 = arith.truncf %10 : vector<512x128xf32> to vector<512x128xbf16>
    %c0_12 = arith.constant 0 : index
    %c0_13 = arith.constant 0 : index
    %14 = vector.load %arg7[%c0_12, %c0_13] : memref<512x128xbf16, #tpu.memory_space<vmem>>, vector<512x128xbf16>
    tpu.vector_store %arg7[%c0_12, %c0_13], %13 {strides = array<i32>} : memref<512x128xbf16, #tpu.memory_space<vmem>>, vector<512x128xbf16>,
    return
  }
  func.func @transform_0(%arg0: i32) -> (i32, i32) {
    %c0_i32 = arith.constant 0 : i32
    %c0_i32_0 = arith.constant 0 : i32
    return %arg0, %c0_i32 : i32, i32
  }
  func.func @transform_1(%arg0: i32) -> (i32, i32) {
    %c0_i32 = arith.constant 0 : i32
    %c0_i32_0 = arith.constant 0 : i32
    %c0_i32_1 = arith.constant 0 : i32
    return %c0_i32, %c0_i32_0 : i32, i32
  }
  func.func @transform_2(%arg0: i32) -> (i32, i32) {
    %c0_i32 = arith.constant 0 : i32
    %c0_i32_0 = arith.constant 0 : i32
    %c0_i32_1 = arith.constant 0 : i32
    return %c0_i32, %c0_i32_0 : i32, i32
  }
  func.func @transform_3(%arg0: i32) -> (i32, i32) {
    %c0_i32 = arith.constant 0 : i32
    %c0_i32_0 = arith.constant 0 : i32
    %c0_i32_1 = arith.constant 0 : i32
    return %c0_i32, %c0_i32_0 : i32, i32
  }
  func.func @transform_4(%arg0: i32) -> (i32, i32) {
    %c0_i32 = arith.constant 0 : i32
    %c0_i32_0 = arith.constant 0 : i32
    %c0_i32_1 = arith.constant 0 : i32
    return %c0_i32, %c0_i32_0 : i32, i32
  }
  func.func @transform_5(%arg0: i32) -> (i32, i32) {
    %c0_i32 = arith.constant 0 : i32
    %c0_i32_0 = arith.constant 0 : i32
    return %arg0, %c0_i32 : i32, i32
  }
  func.func @transform_6(%arg0: i32) -> (i32, i32) {
    %c0_i32 = arith.constant 0 : i32
    %c0_i32_0 = arith.constant 0 : i32
    return %arg0, %c0_i32 : i32, i32
  }
}

module attributes {stable_mosaic.version = 11 : i64} {
  func.func @_matmul_kernel(%arg0: i32, %arg1: i32, %arg2: memref<64x128xbf16, #tpu.memory_space<vmem>>, %arg3: memref<128x128xbf16, #tpu.memory_space<vmem>>, %arg4: memref<1x128xf32, #tpu.memory_space<vmem>>, %arg5: memref<64x128xbf16, #tpu.memory_space<vmem>>) attributes {dimension_semantics = [#tpu.dimension_semantics<parallel>, #tpu.dimension_semantics<parallel>], iteration_bounds = array<i64: 1, 1>, scalar_prefetch = 0 : i64, scratch_operands = 0 : i64, tpu.core_type = #tpu.core_type<tc>, window_params = [{transform_indices = @transform_0, window_bounds = array<i64: 64, 128>}, {transform_indices = @transform_1, window_bounds = array<i64: 128, 128>}, {transform_indices = @transform_2, window_bounds = array<i64: 1, 128>}, {transform_indices = @transform_3, window_bounds = array<i64: 64, 128>}]} {
    %c0 = arith.constant 0 : index
    %c0_0 = arith.constant 0 : index
    %0 = vector.load %arg2[%c0, %c0_0] : memref<64x128xbf16, #tpu.memory_space<vmem>>, vector<64x128xbf16>
    %c0_1 = arith.constant 0 : index
    %c0_2 = arith.constant 0 : index
    %1 = vector.load %arg3[%c0_1, %c0_2] : memref<128x128xbf16, #tpu.memory_space<vmem>>, vector<128x128xbf16>
    %cst = arith.constant dense<0.000000e+00> : vector<64x128xf32>
    %2 = tpu.matmul %0, %1, %cst {dimension_numbers = #tpu.dot_dimension_numbers<[1], [0], [0], [1], [0, 0, 1, 1], [], []>} : vector<64x128xbf16>, vector<128x128xbf16>, vector<64x128xf32> -> vector<64x128xf32>
    %c0_3 = arith.constant 0 : index
    %c0_4 = arith.constant 0 : index
    %3 = vector.load %arg4[%c0_3, %c0_4] : memref<1x128xf32, #tpu.memory_space<vmem>>, vector<1x128xf32>
    %4 = vector.broadcast %3 : vector<1x128xf32> to vector<64x128xf32>
    %5 = arith.addf %2, %4 : vector<64x128xf32>
    %6 = arith.truncf %5 : vector<64x128xf32> to vector<64x128xbf16>
    %c0_5 = arith.constant 0 : index
    %c0_6 = arith.constant 0 : index
    %7 = vector.load %arg5[%c0_5, %c0_6] : memref<64x128xbf16, #tpu.memory_space<vmem>>, vector<64x128xbf16>
    tpu.vector_store %arg5[%c0_5, %c0_6], %6 {strides = array<i32>} : memref<64x128xbf16, #tpu.memory_space<vmem>>, vector<64x128xbf16>,
    return
  }
  func.func @transform_0(%arg0: i32, %arg1: i32) -> (i32, i32) {
    %c0_i32 = arith.constant 0 : i32
    %c0_i32_0 = arith.constant 0 : i32
    return %arg0, %c0_i32 : i32, i32
  }
  func.func @transform_1(%arg0: i32, %arg1: i32) -> (i32, i32) {
    %c0_i32 = arith.constant 0 : i32
    %c0_i32_0 = arith.constant 0 : i32
    return %c0_i32, %arg1 : i32, i32
  }
  func.func @transform_2(%arg0: i32, %arg1: i32) -> (i32, i32) {
    %c0_i32 = arith.constant 0 : i32
    %c0_i32_0 = arith.constant 0 : i32
    return %c0_i32, %arg1 : i32, i32
  }
  func.func @transform_3(%arg0: i32, %arg1: i32) -> (i32, i32) {
    %c0_i32 = arith.constant 0 : i32
    return %arg0, %arg1 : i32, i32
  }
}

module attributes {stable_mosaic.version = 11 : i64} {
  func.func @_flash_attn_kernel(%arg0: i32, %arg1: i32, %arg2: i32, %arg3: memref<1x64x128xbf16, #tpu.memory_space<vmem>>, %arg4: memref<1x128x128xbf16, #tpu.memory_space<vmem>>, %arg5: memref<1x128x128xbf16, #tpu.memory_space<vmem>>, %arg6: memref<128x128xbf16, #tpu.memory_space<vmem>>, %arg7: memref<1x128xf32, #tpu.memory_space<vmem>>, %arg8: memref<1x64x128xbf16, #tpu.memory_space<vmem>>, %arg9: memref<1x64x1xf32, #tpu.memory_space<vmem>>, %arg10: memref<1x64x1xf32, #tpu.memory_space<vmem>>, %arg11: memref<1x64x128xf32, #tpu.memory_space<vmem>>) attributes {dimension_semantics = [#tpu.dimension_semantics<parallel>, #tpu.dimension_semantics<parallel>, #tpu.dimension_semantics<arbitrary>], iteration_bounds = array<i64: 4, 1, 1>, scalar_prefetch = 0 : i64, scratch_operands = 3 : i64, tpu.core_type = #tpu.core_type<tc>, window_params = [{transform_indices = @transform_0, window_bounds = array<i64: 1, 64, 128>}, {transform_indices = @transform_1, window_bounds = array<i64: 1, 128, 128>}, {transform_indices = @transform_2, window_bounds = array<i64: 1, 128, 128>}, {pipeline_mode = #tpu.pipeline_mode<synchronous>, transform_indices = @transform_3, window_bounds = array<i64: 128, 128>}, {pipeline_mode = #tpu.pipeline_mode<synchronous>, transform_indices = @transform_4, window_bounds = array<i64: 1, 128>}, {transform_indices = @transform_5, window_bounds = array<i64: 1, 64, 128>}]} {
    %c0_i32 = arith.constant 0 : i32
    %0 = arith.cmpi eq, %arg2, %c0_i32 : i32
    %1 = arith.extui %0 : i1 to i32
    %c0_i32_0 = arith.constant 0 : i32
    %2 = arith.cmpi ne, %1, %c0_i32_0 : i32
    scf.if %2 {
      %cst_32 = arith.constant 0xFF800000 : f32
      %45 = vector.broadcast %cst_32 : f32 to vector<1x64x1xf32>
      %c0_33 = arith.constant 0 : index
      %c0_34 = arith.constant 0 : index
      %c0_35 = arith.constant 0 : index
      %46 = vector.load %arg9[%c0_33, %c0_34, %c0_35] : memref<1x64x1xf32, #tpu.memory_space<vmem>>, vector<1x64x1xf32>
      tpu.vector_store %arg9[%c0_33, %c0_34, %c0_35], %45 {strides = array<i32>} : memref<1x64x1xf32, #tpu.memory_space<vmem>>, vector<1x64x1xf32>,
      %cst_36 = arith.constant 0.000000e+00 : f32
      %47 = vector.broadcast %cst_36 : f32 to vector<1x64x1xf32>
      %c0_37 = arith.constant 0 : index
      %c0_38 = arith.constant 0 : index
      %c0_39 = arith.constant 0 : index
      %48 = vector.load %arg10[%c0_37, %c0_38, %c0_39] : memref<1x64x1xf32, #tpu.memory_space<vmem>>, vector<1x64x1xf32>
      tpu.vector_store %arg10[%c0_37, %c0_38, %c0_39], %47 {strides = array<i32>} : memref<1x64x1xf32, #tpu.memory_space<vmem>>, vector<1x64x1xf32>,
      %cst_40 = arith.constant 0.000000e+00 : f32
      %49 = vector.broadcast %cst_40 : f32 to vector<1x64x128xf32>
      %c0_41 = arith.constant 0 : index
      %c0_42 = arith.constant 0 : index
      %c0_43 = arith.constant 0 : index
      %50 = vector.load %arg11[%c0_41, %c0_42, %c0_43] : memref<1x64x128xf32, #tpu.memory_space<vmem>>, vector<1x64x128xf32>
      tpu.vector_store %arg11[%c0_41, %c0_42, %c0_43], %49 {strides = array<i32>} : memref<1x64x128xf32, #tpu.memory_space<vmem>>, vector<1x64x128xf32>,
    } else {
    }
    %c0 = arith.constant 0 : index
    %c0_1 = arith.constant 0 : index
    %c0_2 = arith.constant 0 : index
    %3 = vector.load %arg3[%c0, %c0_1, %c0_2] : memref<1x64x128xbf16, #tpu.memory_space<vmem>>, vector<1x64x128xbf16>
    %4 = vector.shape_cast %3 : vector<1x64x128xbf16> to vector<64x128xbf16>
    %c0_3 = arith.constant 0 : index
    %c0_4 = arith.constant 0 : index
    %c0_5 = arith.constant 0 : index
    %5 = vector.load %arg4[%c0_3, %c0_4, %c0_5] : memref<1x128x128xbf16, #tpu.memory_space<vmem>>, vector<1x128x128xbf16>
    %6 = vector.shape_cast %5 : vector<1x128x128xbf16> to vector<128x128xbf16>
    %c0_6 = arith.constant 0 : index
    %c0_7 = arith.constant 0 : index
    %c0_8 = arith.constant 0 : index
    %7 = vector.load %arg5[%c0_6, %c0_7, %c0_8] : memref<1x128x128xbf16, #tpu.memory_space<vmem>>, vector<1x128x128xbf16>
    %8 = vector.shape_cast %7 : vector<1x128x128xbf16> to vector<128x128xbf16>
    %cst = arith.constant dense<0.000000e+00> : vector<64x128xf32>
    %9 = tpu.matmul %4, %6, %cst {dimension_numbers = #tpu.dot_dimension_numbers<[1], [1], [0], [0], [0, 0, 1, 0], [], []>} : vector<64x128xbf16>, vector<128x128xbf16>, vector<64x128xf32> -> vector<64x128xf32>
    %c0_9 = arith.constant 0 : index
    %c0_10 = arith.constant 0 : index
    %c0_11 = arith.constant 0 : index
    %10 = vector.load %arg9[%c0_9, %c0_10, %c0_11] : memref<1x64x1xf32, #tpu.memory_space<vmem>>, vector<1x64x1xf32>
    %11 = vector.shape_cast %10 : vector<1x64x1xf32> to vector<64x1xf32>
    %cst_12 = arith.constant dense<0xFF800000> : vector<64xf32>
    %12 = vector.multi_reduction <maximumf>, %9, %cst_12 [1] : vector<64x128xf32> to vector<64xf32>
    %13 = vector.shape_cast %12 : vector<64xf32> to vector<64x1xf32>
    %14 = arith.maximumf %11, %13 : vector<64x1xf32>
    %15 = arith.subf %11, %14 : vector<64x1xf32>
    %16 = math.exp %15 : vector<64x1xf32>
    %17 = vector.broadcast %14 : vector<64x1xf32> to vector<64x128xf32>
    %18 = arith.subf %9, %17 : vector<64x128xf32>
    %19 = math.exp %18 : vector<64x128xf32>
    %c0_13 = arith.constant 0 : index
    %c0_14 = arith.constant 0 : index
    %c0_15 = arith.constant 0 : index
    %20 = vector.load %arg10[%c0_13, %c0_14, %c0_15] : memref<1x64x1xf32, #tpu.memory_space<vmem>>, vector<1x64x1xf32>
    %21 = vector.shape_cast %20 : vector<1x64x1xf32> to vector<64x1xf32>
    %22 = arith.mulf %16, %21 : vector<64x1xf32>
    %cst_16 = arith.constant dense<0.000000e+00> : vector<64xf32>
    %23 = vector.multi_reduction <add>, %19, %cst_16 [1] : vector<64x128xf32> to vector<64xf32>
    %24 = vector.shape_cast %23 : vector<64xf32> to vector<64x1xf32>
    %25 = arith.addf %22, %24 : vector<64x1xf32>
    %c0_17 = arith.constant 0 : index
    %c0_18 = arith.constant 0 : index
    %c0_19 = arith.constant 0 : index
    %26 = vector.load %arg10[%c0_17, %c0_18, %c0_19] : memref<1x64x1xf32, #tpu.memory_space<vmem>>, vector<1x64x1xf32>
    %27 = vector.shape_cast %26 : vector<1x64x1xf32> to vector<64x1xf32>
    %28 = vector.shape_cast %25 : vector<64x1xf32> to vector<1x64x1xf32>
    tpu.vector_store %arg10[%c0_17, %c0_18, %c0_19], %28 {strides = array<i32>} : memref<1x64x1xf32, #tpu.memory_space<vmem>>, vector<1x64x1xf32>,
    %c0_20 = arith.constant 0 : index
    %c0_21 = arith.constant 0 : index
    %c0_22 = arith.constant 0 : index
    %29 = vector.load %arg11[%c0_20, %c0_21, %c0_22] : memref<1x64x128xf32, #tpu.memory_space<vmem>>, vector<1x64x128xf32>
    %30 = vector.shape_cast %29 : vector<1x64x128xf32> to vector<64x128xf32>
    %31 = vector.broadcast %16 : vector<64x1xf32> to vector<64x128xf32>
    %32 = arith.mulf %31, %30 : vector<64x128xf32>
    %33 = arith.truncf %19 : vector<64x128xf32> to vector<64x128xbf16>
    %cst_23 = arith.constant dense<0.000000e+00> : vector<64x128xf32>
    %34 = tpu.matmul %33, %8, %cst_23 {dimension_numbers = #tpu.dot_dimension_numbers<[1], [0], [0], [1], [0, 0, 1, 1], [], []>} : vector<64x128xbf16>, vector<128x128xbf16>, vector<64x128xf32> -> vector<64x128xf32>
    %35 = arith.addf %32, %34 : vector<64x128xf32>
    %c0_24 = arith.constant 0 : index
    %c0_25 = arith.constant 0 : index
    %c0_26 = arith.constant 0 : index
    %36 = vector.load %arg11[%c0_24, %c0_25, %c0_26] : memref<1x64x128xf32, #tpu.memory_space<vmem>>, vector<1x64x128xf32>
    %37 = vector.shape_cast %36 : vector<1x64x128xf32> to vector<64x128xf32>
    %38 = vector.shape_cast %35 : vector<64x128xf32> to vector<1x64x128xf32>
    tpu.vector_store %arg11[%c0_24, %c0_25, %c0_26], %38 {strides = array<i32>} : memref<1x64x128xf32, #tpu.memory_space<vmem>>, vector<1x64x128xf32>,
    %c0_27 = arith.constant 0 : index
    %c0_28 = arith.constant 0 : index
    %c0_29 = arith.constant 0 : index
    %39 = vector.load %arg9[%c0_27, %c0_28, %c0_29] : memref<1x64x1xf32, #tpu.memory_space<vmem>>, vector<1x64x1xf32>
    %40 = vector.shape_cast %39 : vector<1x64x1xf32> to vector<64x1xf32>
    %41 = vector.shape_cast %14 : vector<64x1xf32> to vector<1x64x1xf32>
    tpu.vector_store %arg9[%c0_27, %c0_28, %c0_29], %41 {strides = array<i32>} : memref<1x64x1xf32, #tpu.memory_space<vmem>>, vector<1x64x1xf32>,
    %c0_i32_30 = arith.constant 0 : i32
    %42 = arith.cmpi eq, %arg2, %c0_i32_30 : i32
    %43 = arith.extui %42 : i1 to i32
    %c0_i32_31 = arith.constant 0 : i32
    %44 = arith.cmpi ne, %43, %c0_i32_31 : i32
    scf.if %44 {
      %c0_32 = arith.constant 0 : index
      %c0_33 = arith.constant 0 : index
      %c0_34 = arith.constant 0 : index
      %45 = vector.load %arg10[%c0_32, %c0_33, %c0_34] : memref<1x64x1xf32, #tpu.memory_space<vmem>>, vector<1x64x1xf32>
      %46 = vector.shape_cast %45 : vector<1x64x1xf32> to vector<64x1xf32>
      %47 = tpu.reciprocal %46 {approx = true} : vector<64x1xf32> -> vector<64x1xf32>
      %c0_35 = arith.constant 0 : index
      %c0_36 = arith.constant 0 : index
      %c0_37 = arith.constant 0 : index
      %48 = vector.load %arg11[%c0_35, %c0_36, %c0_37] : memref<1x64x128xf32, #tpu.memory_space<vmem>>, vector<1x64x128xf32>
      %49 = vector.shape_cast %48 : vector<1x64x128xf32> to vector<64x128xf32>
      %50 = vector.broadcast %47 : vector<64x1xf32> to vector<64x128xf32>
      %51 = arith.mulf %49, %50 : vector<64x128xf32>
      %52 = arith.truncf %51 : vector<64x128xf32> to vector<64x128xbf16>
      %c0_38 = arith.constant 0 : index
      %c0_39 = arith.constant 0 : index
      %53 = vector.load %arg6[%c0_38, %c0_39] : memref<128x128xbf16, #tpu.memory_space<vmem>>, vector<128x128xbf16>
      %cst_40 = arith.constant dense<0.000000e+00> : vector<64x128xf32>
      %54 = tpu.matmul %52, %53, %cst_40 {dimension_numbers = #tpu.dot_dimension_numbers<[1], [0], [0], [1], [0, 0, 1, 1], [], []>} : vector<64x128xbf16>, vector<128x128xbf16>, vector<64x128xf32> -> vector<64x128xf32>
      %c0_41 = arith.constant 0 : index
      %c0_42 = arith.constant 0 : index
      %55 = vector.load %arg7[%c0_41, %c0_42] : memref<1x128xf32, #tpu.memory_space<vmem>>, vector<1x128xf32>
      %56 = vector.broadcast %55 : vector<1x128xf32> to vector<64x128xf32>
      %57 = arith.addf %54, %56 : vector<64x128xf32>
      %58 = arith.truncf %57 : vector<64x128xf32> to vector<64x128xbf16>
      %c0_43 = arith.constant 0 : index
      %c0_44 = arith.constant 0 : index
      %c0_45 = arith.constant 0 : index
      %59 = vector.load %arg8[%c0_43, %c0_44, %c0_45] : memref<1x64x128xbf16, #tpu.memory_space<vmem>>, vector<1x64x128xbf16>
      %60 = vector.shape_cast %59 : vector<1x64x128xbf16> to vector<64x128xbf16>
      %61 = vector.shape_cast %58 : vector<64x128xbf16> to vector<1x64x128xbf16>
      tpu.vector_store %arg8[%c0_43, %c0_44, %c0_45], %61 {strides = array<i32>} : memref<1x64x128xbf16, #tpu.memory_space<vmem>>, vector<1x64x128xbf16>,
    } else {
    }
    return
  }
  func.func @transform_0(%arg0: i32, %arg1: i32, %arg2: i32) -> (i32, i32, i32) {
    %c0_i32 = arith.constant 0 : i32
    %c0_i32_0 = arith.constant 0 : i32
    %c0_i32_1 = arith.constant 0 : i32
    return %c0_i32, %arg1, %c0_i32_0 : i32, i32, i32
  }
  func.func @transform_1(%arg0: i32, %arg1: i32, %arg2: i32) -> (i32, i32, i32) {
    %c0_i32 = arith.constant 0 : i32
    %c0_i32_0 = arith.constant 0 : i32
    return %arg0, %arg2, %c0_i32 : i32, i32, i32
  }
  func.func @transform_2(%arg0: i32, %arg1: i32, %arg2: i32) -> (i32, i32, i32) {
    %c0_i32 = arith.constant 0 : i32
    %c0_i32_0 = arith.constant 0 : i32
    return %arg0, %arg2, %c0_i32 : i32, i32, i32
  }
  func.func @transform_3(%arg0: i32, %arg1: i32, %arg2: i32) -> (i32, i32) {
    %c0_i32 = arith.constant 0 : i32
    %c0_i32_0 = arith.constant 0 : i32
    %c0_i32_1 = arith.constant 0 : i32
    return %c0_i32, %c0_i32_0 : i32, i32
  }
  func.func @transform_4(%arg0: i32, %arg1: i32, %arg2: i32) -> (i32, i32) {
    %c0_i32 = arith.constant 0 : i32
    %c0_i32_0 = arith.constant 0 : i32
    %c0_i32_1 = arith.constant 0 : i32
    return %c0_i32, %c0_i32_0 : i32, i32
  }
  func.func @transform_5(%arg0: i32, %arg1: i32, %arg2: i32) -> (i32, i32, i32) {
    %c0_i32 = arith.constant 0 : i32
    %c0_i32_0 = arith.constant 0 : i32
    return %arg0, %arg1, %c0_i32 : i32, i32, i32
  }
}

module attributes {stable_mosaic.version = 11 : i64} {
  func.func @_dec_head_kernel(%arg0: i32, %arg1: memref<256x128xbf16, #tpu.memory_space<vmem>>, %arg2: memref<128x128xbf16, #tpu.memory_space<vmem>>, %arg3: memref<1x128xf32, #tpu.memory_space<vmem>>, %arg4: memref<128x2xbf16, #tpu.memory_space<vmem>>, %arg5: memref<1x2xf32, #tpu.memory_space<vmem>>, %arg6: memref<256x2xbf16, #tpu.memory_space<vmem>>) attributes {dimension_semantics = [#tpu.dimension_semantics<parallel>], iteration_bounds = array<i64: 1>, scalar_prefetch = 0 : i64, scratch_operands = 0 : i64, tpu.core_type = #tpu.core_type<tc>, window_params = [{transform_indices = @transform_0, window_bounds = array<i64: 256, 128>}, {pipeline_mode = #tpu.pipeline_mode<synchronous>, transform_indices = @transform_1, window_bounds = array<i64: 128, 128>}, {pipeline_mode = #tpu.pipeline_mode<synchronous>, transform_indices = @transform_2, window_bounds = array<i64: 1, 128>}, {pipeline_mode = #tpu.pipeline_mode<synchronous>, transform_indices = @transform_3, window_bounds = array<i64: 128, 2>}, {pipeline_mode = #tpu.pipeline_mode<synchronous>, transform_indices = @transform_4, window_bounds = array<i64: 1, 2>}, {transform_indices = @transform_5, window_bounds = array<i64: 256, 2>}]} {
    %c0 = arith.constant 0 : index
    %c0_0 = arith.constant 0 : index
    %0 = vector.load %arg1[%c0, %c0_0] : memref<256x128xbf16, #tpu.memory_space<vmem>>, vector<256x128xbf16>
    %c0_1 = arith.constant 0 : index
    %c0_2 = arith.constant 0 : index
    %1 = vector.load %arg2[%c0_1, %c0_2] : memref<128x128xbf16, #tpu.memory_space<vmem>>, vector<128x128xbf16>
    %cst = arith.constant dense<0.000000e+00> : vector<256x128xf32>
    %2 = tpu.matmul %0, %1, %cst {dimension_numbers = #tpu.dot_dimension_numbers<[1], [0], [0], [1], [0, 0, 1, 1], [], []>} : vector<256x128xbf16>, vector<128x128xbf16>, vector<256x128xf32> -> vector<256x128xf32>
    %c0_3 = arith.constant 0 : index
    %c0_4 = arith.constant 0 : index
    %3 = vector.load %arg3[%c0_3, %c0_4] : memref<1x128xf32, #tpu.memory_space<vmem>>, vector<1x128xf32>
    %4 = vector.broadcast %3 : vector<1x128xf32> to vector<256x128xf32>
    %5 = arith.addf %2, %4 : vector<256x128xf32>
    %cst_5 = arith.constant 0.000000e+00 : f32
    %6 = vector.broadcast %cst_5 : f32 to vector<256x128xf32>
    %7 = arith.maximumf %5, %6 : vector<256x128xf32>
    %8 = arith.truncf %7 : vector<256x128xf32> to vector<256x128xbf16>
    %c0_6 = arith.constant 0 : index
    %c0_7 = arith.constant 0 : index
    %9 = vector.load %arg4[%c0_6, %c0_7] : memref<128x2xbf16, #tpu.memory_space<vmem>>, vector<128x2xbf16>
    %cst_8 = arith.constant dense<0.000000e+00> : vector<256x2xf32>
    %10 = tpu.matmul %8, %9, %cst_8 {dimension_numbers = #tpu.dot_dimension_numbers<[1], [0], [0], [1], [0, 0, 1, 1], [], []>} : vector<256x128xbf16>, vector<128x2xbf16>, vector<256x2xf32> -> vector<256x2xf32>
    %c0_9 = arith.constant 0 : index
    %c0_10 = arith.constant 0 : index
    %11 = vector.load %arg5[%c0_9, %c0_10] : memref<1x2xf32, #tpu.memory_space<vmem>>, vector<1x2xf32>
    %12 = vector.broadcast %11 : vector<1x2xf32> to vector<256x2xf32>
    %13 = arith.addf %10, %12 : vector<256x2xf32>
    %14 = arith.truncf %13 : vector<256x2xf32> to vector<256x2xbf16>
    %c0_11 = arith.constant 0 : index
    %c0_12 = arith.constant 0 : index
    %15 = vector.load %arg6[%c0_11, %c0_12] : memref<256x2xbf16, #tpu.memory_space<vmem>>, vector<256x2xbf16>
    tpu.vector_store %arg6[%c0_11, %c0_12], %14 {strides = array<i32>} : memref<256x2xbf16, #tpu.memory_space<vmem>>, vector<256x2xbf16>,
    return
  }
  func.func @transform_0(%arg0: i32) -> (i32, i32) {
    %c0_i32 = arith.constant 0 : i32
    %c0_i32_0 = arith.constant 0 : i32
    return %arg0, %c0_i32 : i32, i32
  }
  func.func @transform_1(%arg0: i32) -> (i32, i32) {
    %c0_i32 = arith.constant 0 : i32
    %c0_i32_0 = arith.constant 0 : i32
    %c0_i32_1 = arith.constant 0 : i32
    return %c0_i32, %c0_i32_0 : i32, i32
  }
  func.func @transform_2(%arg0: i32) -> (i32, i32) {
    %c0_i32 = arith.constant 0 : i32
    %c0_i32_0 = arith.constant 0 : i32
    %c0_i32_1 = arith.constant 0 : i32
    return %c0_i32, %c0_i32_0 : i32, i32
  }
  func.func @transform_3(%arg0: i32) -> (i32, i32) {
    %c0_i32 = arith.constant 0 : i32
    %c0_i32_0 = arith.constant 0 : i32
    %c0_i32_1 = arith.constant 0 : i32
    return %c0_i32, %c0_i32_0 : i32, i32
  }
  func.func @transform_4(%arg0: i32) -> (i32, i32) {
    %c0_i32 = arith.constant 0 : i32
    %c0_i32_0 = arith.constant 0 : i32
    %c0_i32_1 = arith.constant 0 : i32
    return %c0_i32, %c0_i32_0 : i32, i32
  }
  func.func @transform_5(%arg0: i32) -> (i32, i32) {
    %c0_i32 = arith.constant 0 : i32
    %c0_i32_0 = arith.constant 0 : i32
    return %arg0, %c0_i32 : i32, i32
  }
}

</mosaic_0001>

<bundles_post_ra>
// kernel: cross_view_transformer_forward.4
= control target key start
LH: loop header
LB: loop body
LE: loop exit
PB: predicated region body
PF: predicated region fallthrough
CT: control target
= control target key end

     0   :  { %s414_s1 = inlined_call_operand.vmem [shape: bf16[128,128], index: 1, kind: input, shape index: {}]   ;;  %s415_s0 = inlined_call_operand.vmem [shape: bf16[64,128], index: 0, kind: input, shape index: {}]   ;;  %s416_s2 = inlined_call_operand.vmem [shape: f32[1,128], index: 2, kind: input, shape index: {}]   ;;  %s417_s3 = inlined_call_operand.vmem [shape: bf16[64,128], index: 3, kind: output, shape index: {}]  }
   0x1   :  { %v331_v0 = vld [vmem:[%s414_s1 + $0x38] sm:$0xff]   ;;  %v332_v1 = vld [vmem:[%s414_s1 + $0x30] sm:$0xff]   ;;  %v333_v2 = vld [vmem:[%s414_s1 + $0x28] sm:$0xff]  }
   0x2   :  { %291 = vmatprep.subr.bf16.mxu0 %v331_v0  ;;  %315 = vmatprep.subr.bf16.mxu1 %v331_v0  ;;  %v334_v3 = vld [vmem:[%s414_s1 + $0x20] sm:$0xff]   ;;  %v340_v5 = vld [vmem:[%s415_s0 + $0x10] sm:$0xff]   ;;  %v335_v6 = vld [vmem:[%s414_s1 + $0x18] sm:$0xff]  }
   0x3   :  { %292 = vmatpush3.bf16.msra.mxu0 %v331_v0  ;;  %323 = vmatpush3.bf16.msra.mxu1 %v331_v0  ;;  %v339_v4 = vld [vmem:[%s415_s0] sm:$0xff]   ;;  %v336_v7 = vld [vmem:[%s414_s1 + $0x10] sm:$0xff]   ;;  %v337_v8 = vld [vmem:[%s414_s1 + $0x8] sm:$0xff]  }
   0x4   :  { %293 = vmatprep.subr.bf16.mxu0 %v332_v1  ;;  %316 = vmatprep.subr.bf16.mxu1 %v332_v1  ;;  %v338_v9 = vld [vmem:[%s414_s1] sm:$0xff]   ;;  %v341_v10 = vld [vmem:[%s415_s0 + $0x8] sm:$0xff]   ;;  %v342_v11 = vld [vmem:[%s415_s0 + $0x18] sm:$0xff]  }
   0x5   :  { %307 = vmatprep.mubr.bf16.mxu0 %v339_v4  ;;  %311 = vmatprep.mubr.bf16.mxu1 %v340_v5  ;;  %v227_v14 = vld [vmem:[%s416_s2] ss:$0 sm:$0xff] }
   0x7   :  { %294 = vmatpush3.bf16.msra.mxu0 %v332_v1  ;;  %324 = vmatpush3.bf16.msra.mxu1 %v332_v1 }
   0x8   :  { %295 = vmatprep.subr.bf16.mxu0 %v333_v2  ;;  %317 = vmatprep.subr.bf16.mxu1 %v333_v2 }
   0xb   :  { %296 = vmatpush3.bf16.msra.mxu0 %v333_v2  ;;  %325 = vmatpush3.bf16.msra.mxu1 %v333_v2 }
   0xc   :  { %297 = vmatprep.subr.bf16.mxu0 %v334_v3  ;;  %318 = vmatprep.subr.bf16.mxu1 %v334_v3 }
   0xf   :  { %298 = vmatpush3.bf16.msra.mxu0 %v334_v3  ;;  %326 = vmatpush3.bf16.msra.mxu1 %v334_v3 }
  0x10   :  { %299 = vmatprep.subr.bf16.mxu0 %v335_v6  ;;  %319 = vmatprep.subr.bf16.mxu1 %v335_v6 }
  0x13   :  { %300 = vmatpush3.bf16.msra.mxu0 %v335_v6  ;;  %327 = vmatpush3.bf16.msra.mxu1 %v335_v6 }
  0x14   :  { %301 = vmatprep.subr.bf16.mxu0 %v336_v7  ;;  %320 = vmatprep.subr.bf16.mxu1 %v336_v7 }
  0x17   :  { %302 = vmatpush3.bf16.msra.mxu0 %v336_v7  ;;  %328 = vmatpush3.bf16.msra.mxu1 %v336_v7 }
  0x18   :  { %303 = vmatprep.subr.bf16.mxu0 %v337_v8  ;;  %321 = vmatprep.subr.bf16.mxu1 %v337_v8 }
  0x1b   :  { %304 = vmatpush3.bf16.msra.mxu0 %v337_v8  ;;  %329 = vmatpush3.bf16.msra.mxu1 %v337_v8 }
  0x1c   :  { %305 = vmatprep.subr.bf16.mxu0 %v338_v9  ;;  %322 = vmatprep.subr.bf16.mxu1 %v338_v9 }
  0x1f   :  { %306 = vmatpush3.bf16.msra.mxu0 %v338_v9  ;;  %330 = vmatpush3.bf16.msra.mxu1 %v338_v9 }
  0x22   :  { %308 = vmatmul.mubr.bf16.vlgmr.msra.gmra.mxu0 %v341_v10  ;;  %312 = vmatmul.mubr.bf16.vlgmr.msra.gmra.mxu1 %v342_v11 }
  0xe2   :  { %v309_v12 = vpop.f32.mrf.mxu0  ;;  %v313_v13 = vpop.f32.mrf.mxu1 }
  0xe3   :  { %v161_v19 = vadd.f32 %v309_v12, %v227_v14  ;;  %v177_v20 = vadd.f32 %v313_v13, %v227_v14 }
  0xe4   :  { %v152_v15 = vpop.f32.mrf.mxu0  ;;  %v168_v16 = vpop.f32.mrf.mxu1 }
  0xe5   :  { %v153_v23 = vadd.f32 %v227_v14, %v152_v15  ;;  %v169_v24 = vadd.f32 %v227_v14, %v168_v16 }
  0xe6   :  { %v310_v17 = vpop.f32.mrf.mxu0  ;;  %v314_v18 = vpop.f32.mrf.mxu1 }
  0xe7   :  { %v164_v21 = vadd.f32 %v310_v17, %v227_v14  ;;  %v180_v22 = vadd.f32 %v314_v18, %v227_v14 }
  0xe8   :  { %v155_v25 = vpop.f32.mrf.mxu0  ;;  %v171_v26 = vpop.f32.mrf.mxu1 }
  0xe9   :  { %v264_v27 = vpack.c.bf16 %v164_v21, %v161_v19  ;;  %v274_v28 = vpack.c.bf16 %v180_v22, %v177_v20  ;;  %v156_v29 = vadd.f32 %v227_v14, %v155_v25  ;;  %v172_v30 = vadd.f32 %v227_v14, %v171_v26 }
  0xeb   :  { %276 = vst [vmem:[%s417_s3 + $0x8] sm:$0xff] %v264_v27   ;;  %278 = vst [vmem:[%s417_s3 + $0x18] sm:$0xff] %v274_v28   ;;  %v259_v31 = vpack.c.bf16 %v156_v29, %v153_v23  ;;  %v269_v32 = vpack.c.bf16 %v172_v30, %v169_v24 }
  0xed   :  { %260 = vst [vmem:[%s417_s3] sm:$0xff] %v259_v31   ;;  %277 = vst [vmem:[%s417_s3 + $0x10] sm:$0xff] %v269_v32  }

// kernel: cross_view_transformer_forward.5
= control target key start
LH: loop header
LB: loop body
LE: loop exit
PB: predicated region body
PF: predicated region fallthrough
CT: control target
= control target key end

     0   :  { %s3132_s1 = inlined_call_operand.vmem [shape: bf16[128,128], index: 1, kind: input, shape index: {}]   ;;  %s3133_s3 = inlined_call_operand.vmem [shape: bf16[128,128], index: 3, kind: input, shape index: {}]   ;;  %s3134_s0 = inlined_call_operand.vmem [shape: bf16[512,128], index: 0, kind: input, shape index: {}]   ;;  %s3135_s2 = inlined_call_operand.vmem [shape: f32[1,128], index: 2, kind: input, shape index: {}]   ;;  %s3136_s4 = inlined_call_operand.vmem [shape: f32[1,128], index: 4, kind: input, shape index: {}]   ;;  %s3137_s5 = inlined_call_operand.vmem [shape: bf16[512,128], index: 5, kind: output, shape index: {0}]   ;;  %s3138_s6 = inlined_call_operand.vmem [shape: bf16[512,128], index: 6, kind: output, shape index: {1}]  }
   0x1   :  { %v2575_v0 = vld [vmem:[%s3132_s1 + $0x38] sm:$0xff]   ;;  %v2577_v2 = vld [vmem:[%s3132_s1 + $0x30] sm:$0xff]   ;;  %v2579_v4 = vld [vmem:[%s3132_s1 + $0x28] sm:$0xff]  }
   0x2   :  { %v2576_v1 = vld [vmem:[%s3133_s3 + $0x38] sm:$0xff]   ;;  %2415 = vmatprep.subr.bf16.mxu0 %v2575_v0  ;;  %v2578_v3 = vld [vmem:[%s3133_s3 + $0x30] sm:$0xff]   ;;  %v2580_v5 = vld [vmem:[%s3133_s3 + $0x28] sm:$0xff]  }
   0x3   :  { %2495 = vmatprep.subr.bf16.mxu1 %v2576_v1  ;;  %2416 = vmatpush3.bf16.msra.mxu0 %v2575_v0  ;;  %v2581_v6 = vld [vmem:[%s3132_s1 + $0x20] sm:$0xff]   ;;  %v2583_v8 = vld [vmem:[%s3132_s1 + $0x18] sm:$0xff]   ;;  %v2585_v10 = vld [vmem:[%s3132_s1 + $0x10] sm:$0xff]  }
   0x4   :  { %2496 = vmatpush3.bf16.msra.mxu1 %v2576_v1  ;;  %2417 = vmatprep.subr.bf16.mxu0 %v2577_v2  ;;  %v2582_v7 = vld [vmem:[%s3133_s3 + $0x20] sm:$0xff]   ;;  %v2584_v9 = vld [vmem:[%s3133_s3 + $0x18] sm:$0xff]   ;;  %v2586_v12 = vld [vmem:[%s3133_s3 + $0x10] sm:$0xff]  }
   0x5   :  { %2497 = vmatprep.subr.bf16.mxu1 %v2578_v3  ;;  %v2591_v11 = vld [vmem:[%s3134_s0] sm:$0xff]   ;;  %v2587_v13 = vld [vmem:[%s3132_s1 + $0x8] sm:$0xff]   ;;  %v2593_v18 = vld [vmem:[%s3134_s0 + $0x10] sm:$0xff]  }
   0x6   :  { %2431 = vmatprep.mubr.bf16.mxu0 %v2591_v11  ;;  %2511 = vmatprep.mubr.bf16.mxu1 %v2591_v11  ;;  %v2588_v14 = vld [vmem:[%s3133_s3 + $0x8] sm:$0xff]   ;;  %v2589_v15 = vld [vmem:[%s3132_s1] sm:$0xff]   ;;  %v2594_v19 = vld [vmem:[%s3134_s0 + $0x18] sm:$0xff]  }
   0x7   :  { %2418 = vmatpush3.bf16.msra.mxu0 %v2577_v2  ;;  %v2590_v16 = vld [vmem:[%s3133_s3] sm:$0xff]   ;;  %v2592_v17 = vld [vmem:[%s3134_s0 + $0x8] sm:$0xff]   ;;  %v2597_v22 = vld [vmem:[%s3134_s0 + $0x30] sm:$0xff]  }
   0x8   :  { %2498 = vmatpush3.bf16.msra.mxu1 %v2578_v3  ;;  %2419 = vmatprep.subr.bf16.mxu0 %v2579_v4  ;;  %v2595_v20 = vld [vmem:[%s3134_s0 + $0x20] sm:$0xff]   ;;  %v2596_v21 = vld [vmem:[%s3134_s0 + $0x28] sm:$0xff]   ;;  %v2598_v23 = vld [vmem:[%s3134_s0 + $0x38] sm:$0xff]  }
   0x9   :  { %2499 = vmatprep.subr.bf16.mxu1 %v2580_v5  ;;  %v2599_v24 = vld [vmem:[%s3134_s0 + $0x40] sm:$0xff]   ;;  %v2600_v25 = vld [vmem:[%s3134_s0 + $0x48] sm:$0xff]   ;;  %v2601_v26 = vld [vmem:[%s3134_s0 + $0x50] sm:$0xff]  }
   0xa   :  { %v2602_v27 = vld [vmem:[%s3134_s0 + $0x58] sm:$0xff]   ;;  %v2603_v28 = vld [vmem:[%s3134_s0 + $0x60] sm:$0xff]   ;;  %v2604_v29 = vld [vmem:[%s3134_s0 + $0x68] sm:$0xff]  }
   0xb   :  { %2420 = vmatpush3.bf16.msra.mxu0 %v2579_v4  ;;  %v2605_v30 = vld [vmem:[%s3134_s0 + $0x70] sm:$0xff]   ;;  %v2606_v31 = vld [vmem:[%s3134_s0 + $0x78] sm:$0xff]   ;;  %v2607_v32 = vld [vmem:[%s3134_s0 + $0x80] sm:$0xff]  }
   0xc   :  { %2500 = vmatpush3.bf16.msra.mxu1 %v2580_v5  ;;  %2421 = vmatprep.subr.bf16.mxu0 %v2581_v6  ;;  %v2608_v33 = vld [vmem:[%s3134_s0 + $0x88] sm:$0xff]   ;;  %v2609_v34 = vld [vmem:[%s3134_s0 + $0x90] sm:$0xff]   ;;  %v2610_v35 = vld [vmem:[%s3134_s0 + $0x98] sm:$0xff]  }
   0xd   :  { %2501 = vmatprep.subr.bf16.mxu1 %v2582_v7  ;;  %v2611_v36 = vld [vmem:[%s3134_s0 + $0xa0] sm:$0xff]   ;;  %v2612_v37 = vld [vmem:[%s3134_s0 + $0xa8] sm:$0xff]   ;;  %v2613_v38 = vld [vmem:[%s3134_s0 + $0xb0] sm:$0xff]  }
   0xe   :  { %v2614_v39 = vld [vmem:[%s3134_s0 + $0xb8] sm:$0xff]   ;;  %v2615_v40 = vld [vmem:[%s3134_s0 + $0xc0] sm:$0xff]   ;;  %v2616_v41 = vld [vmem:[%s3134_s0 + $0xc8] sm:$0xff]  }
   0xf   :  { %2422 = vmatpush3.bf16.msra.mxu0 %v2581_v6  ;;  %v2617_v42 = vld [vmem:[%s3134_s0 + $0xd0] sm:$0xff]   ;;  %v2618_v43 = vld [vmem:[%s3134_s0 + $0xd8] sm:$0xff]   ;;  %v2619_v44 = vld [vmem:[%s3134_s0 + $0xe0] sm:$0xff]  }
  0x10   :  { %2502 = vmatpush3.bf16.msra.mxu1 %v2582_v7  ;;  %2423 = vmatprep.subr.bf16.mxu0 %v2583_v8  ;;  %v2620_v45 = vld [vmem:[%s3134_s0 + $0xe8] sm:$0xff]   ;;  %v2621_v46 = vld [vmem:[%s3134_s0 + $0xf0] sm:$0xff]   ;;  %v2622_v47 = vld [vmem:[%s3134_s0 + $0xf8] sm:$0xff]  }
  0x11   :  { %2503 = vmatprep.subr.bf16.mxu1 %v2584_v9  ;;  %v2805_v50 = vld [vmem:[%s3135_s2] ss:$0 sm:$0xff] }
  0x12   :  { %v2810_v52 = vld [vmem:[%s3136_s4] ss:$0 sm:$0xff] }
  0x13   :  { %2424 = vmatpush3.bf16.msra.mxu0 %v2583_v8 }
  0x14   :  { %2504 = vmatpush3.bf16.msra.mxu1 %v2584_v9  ;;  %2425 = vmatprep.subr.bf16.mxu0 %v2585_v10 }
  0x15   :  { %2505 = vmatprep.subr.bf16.mxu1 %v2586_v12 }
  0x17   :  { %2426 = vmatpush3.bf16.msra.mxu0 %v2585_v10 }
  0x18   :  { %2506 = vmatpush3.bf16.msra.mxu1 %v2586_v12  ;;  %2427 = vmatprep.subr.bf16.mxu0 %v2587_v13 }
  0x19   :  { %2507 = vmatprep.subr.bf16.mxu1 %v2588_v14 }
  0x1b   :  { %2428 = vmatpush3.bf16.msra.mxu0 %v2587_v13 }
  0x1c   :  { %2508 = vmatpush3.bf16.msra.mxu1 %v2588_v14  ;;  %2429 = vmatprep.subr.bf16.mxu0 %v2589_v15 }
  0x1d   :  { %2509 = vmatprep.subr.bf16.mxu1 %v2590_v16 }
  0x1f   :  { %2430 = vmatpush3.bf16.msra.mxu0 %v2589_v15 }
  0x20   :  { %2510 = vmatpush3.bf16.msra.mxu1 %v2590_v16 }
  0x22   :  { %2432 = vmatmul.mubr.bf16.vlgmr.msra.gmra.mxu0 %v2592_v17 }
  0x23   :  { %2512 = vmatmul.mubr.bf16.vlgmr.msra.gmra.mxu1 %v2592_v17  ;;  %2435 = vmatprep.mubr.bf16.mxu0 %v2593_v18 }
  0x24   :  { %2515 = vmatprep.mubr.bf16.mxu1 %v2593_v18 }
  0x2a   :  { %2436 = vmatmul.mubr.bf16.gmra.mxu0 %v2594_v19 }
  0x2b   :  { %2516 = vmatmul.mubr.bf16.gmra.mxu1 %v2594_v19  ;;  %2439 = vmatprep.mubr.bf16.mxu0 %v2595_v20 }
  0x2c   :  { %2519 = vmatprep.mubr.bf16.mxu1 %v2595_v20 }
  0x32   :  { %2440 = vmatmul.mubr.bf16.gmra.mxu0 %v2596_v21 }
  0x33   :  { %2520 = vmatmul.mubr.bf16.gmra.mxu1 %v2596_v21  ;;  %2443 = vmatprep.mubr.bf16.mxu0 %v2597_v22 }
  0x34   :  { %2523 = vmatprep.mubr.bf16.mxu1 %v2597_v22 }
  0x3a   :  { %2444 = vmatmul.mubr.bf16.gmra.mxu0 %v2598_v23 }
  0x3b   :  { %2524 = vmatmul.mubr.bf16.gmra.mxu1 %v2598_v23  ;;  %2447 = vmatprep.mubr.bf16.mxu0 %v2599_v24 }
  0x3c   :  { %2527 = vmatprep.mubr.bf16.mxu1 %v2599_v24 }
  0x42   :  { %2448 = vmatmul.mubr.bf16.gmra.mxu0 %v2600_v25 }
  0x43   :  { %2528 = vmatmul.mubr.bf16.gmra.mxu1 %v2600_v25  ;;  %2451 = vmatprep.mubr.bf16.mxu0 %v2601_v26 }
  0x44   :  { %2531 = vmatprep.mubr.bf16.mxu1 %v2601_v26 }
  0x4a   :  { %2452 = vmatmul.mubr.bf16.gmra.mxu0 %v2602_v27 }
  0x4b   :  { %2532 = vmatmul.mubr.bf16.gmra.mxu1 %v2602_v27  ;;  %2455 = vmatprep.mubr.bf16.mxu0 %v2603_v28 }
  0x4c   :  { %2535 = vmatprep.mubr.bf16.mxu1 %v2603_v28 }
  0x52   :  { %2456 = vmatmul.mubr.bf16.gmra.mxu0 %v2604_v29 }
  0x53   :  { %2536 = vmatmul.mubr.bf16.gmra.mxu1 %v2604_v29  ;;  %2459 = vmatprep.mubr.bf16.mxu0 %v2605_v30 }
  0x54   :  { %2539 = vmatprep.mubr.bf16.mxu1 %v2605_v30 }
  0x5a   :  { %2460 = vmatmul.mubr.bf16.gmra.mxu0 %v2606_v31 }
  0x5b   :  { %2540 = vmatmul.mubr.bf16.gmra.mxu1 %v2606_v31  ;;  %2463 = vmatprep.mubr.bf16.mxu0 %v2607_v32 }
  0x5c   :  { %2543 = vmatprep.mubr.bf16.mxu1 %v2607_v32 }
  0x62   :  { %2464 = vmatmul.mubr.bf16.gmra.mxu0 %v2608_v33 }
  0x63   :  { %2544 = vmatmul.mubr.bf16.gmra.mxu1 %v2608_v33  ;;  %2467 = vmatprep.mubr.bf16.mxu0 %v2609_v34 }
  0x64   :  { %2547 = vmatprep.mubr.bf16.mxu1 %v2609_v34 }
  0x6a   :  { %2468 = vmatmul.mubr.bf16.gmra.mxu0 %v2610_v35 }
  0x6b   :  { %2548 = vmatmul.mubr.bf16.gmra.mxu1 %v2610_v35  ;;  %2471 = vmatprep.mubr.bf16.mxu0 %v2611_v36 }
  0x6c   :  { %2551 = vmatprep.mubr.bf16.mxu1 %v2611_v36 }
  0x72   :  { %2472 = vmatmul.mubr.bf16.gmra.mxu0 %v2612_v37 }
  0x73   :  { %2552 = vmatmul.mubr.bf16.gmra.mxu1 %v2612_v37  ;;  %2475 = vmatprep.mubr.bf16.mxu0 %v2613_v38 }
  0x74   :  { %2555 = vmatprep.mubr.bf16.mxu1 %v2613_v38 }
  0x7a   :  { %2476 = vmatmul.mubr.bf16.gmra.mxu0 %v2614_v39 }
  0x7b   :  { %2556 = vmatmul.mubr.bf16.gmra.mxu1 %v2614_v39  ;;  %2479 = vmatprep.mubr.bf16.mxu0 %v2615_v40 }
  0x7c   :  { %2559 = vmatprep.mubr.bf16.mxu1 %v2615_v40 }
  0x82   :  { %2480 = vmatmul.mubr.bf16.gmra.mxu0 %v2616_v41 }
  0x83   :  { %2560 = vmatmul.mubr.bf16.gmra.mxu1 %v2616_v41  ;;  %2483 = vmatprep.mubr.bf16.mxu0 %v2617_v42 }
  0x84   :  { %2563 = vmatprep.mubr.bf16.mxu1 %v2617_v42 }
  0x8a   :  { %2484 = vmatmul.mubr.bf16.gmra.mxu0 %v2618_v43 }
  0x8b   :  { %2564 = vmatmul.mubr.bf16.gmra.mxu1 %v2618_v43  ;;  %2487 = vmatprep.mubr.bf16.mxu0 %v2619_v44 }
  0x8c   :  { %2567 = vmatprep.mubr.bf16.mxu1 %v2619_v44 }
  0x92   :  { %2488 = vmatmul.mubr.bf16.gmra.mxu0 %v2620_v45 }
  0x93   :  { %2568 = vmatmul.mubr.bf16.gmra.mxu1 %v2620_v45  ;;  %2491 = vmatprep.mubr.bf16.mxu0 %v2621_v46 }
  0x94   :  { %2571 = vmatprep.mubr.bf16.mxu1 %v2621_v46 }
  0x9a   :  { %2492 = vmatmul.mubr.bf16.gmra.mxu0 %v2622_v47 }
  0x9b   :  { %2572 = vmatmul.mubr.bf16.gmra.mxu1 %v2622_v47 }
  0xe2   :  { %v2433_v48 = vpop.f32.mrf.mxu0 }
  0xe3   :  { %v2513_v49 = vpop.f32.mrf.mxu1  ;;  %v393_v55 = vadd.f32 %v2433_v48, %v2805_v50 }
  0xe4   :  { %v384_v51 = vpop.f32.mrf.mxu0  ;;  %v753_v58 = vadd.f32 %v2513_v49, %v2810_v52 }
  0xe5   :  { %v744_v53 = vpop.f32.mrf.mxu1  ;;  %v385_v61 = vadd.f32 %v2805_v50, %v384_v51 }
  0xe6   :  { %v2434_v54 = vpop.f32.mrf.mxu0  ;;  %v745_v1 = vadd.f32 %v2810_v52, %v744_v53 }
  0xe7   :  { %v396_v56 = vadd.f32 %v2434_v54, %v2805_v50  ;;  %v2514_v57 = vpop.f32.mrf.mxu1 }
  0xe8   :  { %v756_v59 = vadd.f32 %v2514_v57, %v2810_v52  ;;  %v387_v60 = vpop.f32.mrf.mxu0 }
  0xe9   :  { %v1961_v62 = vpack.c.bf16 %v396_v56, %v393_v55  ;;  %v388_v63 = vadd.f32 %v2805_v50, %v387_v60  ;;  %v747_v0 = vpop.f32.mrf.mxu1 }
  0xea   :  { %v2121_v2 = vpack.c.bf16 %v756_v59, %v753_v58  ;;  %v748_v3 = vadd.f32 %v2810_v52, %v747_v0  ;;  %v2437_v4 = vpop.f32.mrf.mxu0 }
  0xeb   :  { %2273 = vst [vmem:[%s3137_s5 + $0x8] sm:$0xff] %v1961_v62   ;;  %v1956_v5 = vpack.c.bf16 %v388_v63, %v385_v61  ;;  %v2517_v6 = vpop.f32.mrf.mxu1  ;;  %v409_v11 = vadd.f32 %v2437_v4, %v2805_v50 }
  0xec   :  { %2304 = vst [vmem:[%s3138_s6 + $0x8] sm:$0xff] %v2121_v2   ;;  %v2116_v7 = vpack.c.bf16 %v748_v3, %v745_v1  ;;  %v400_v8 = vpop.f32.mrf.mxu0  ;;  %v769_v14 = vadd.f32 %v2517_v6, %v2810_v52 }
  0xed   :  { %1957 = vst [vmem:[%s3137_s5] sm:$0xff] %v1956_v5   ;;  %v760_v9 = vpop.f32.mrf.mxu1  ;;  %v401_v17 = vadd.f32 %v2805_v50, %v400_v8 }
  0xee   :  { %2117 = vst [vmem:[%s3138_s6] sm:$0xff] %v2116_v7   ;;  %v2438_v10 = vpop.f32.mrf.mxu0  ;;  %v761_v21 = vadd.f32 %v2810_v52, %v760_v9 }
  0xef   :  { %v412_v12 = vadd.f32 %v2438_v10, %v2805_v50  ;;  %v2518_v13 = vpop.f32.mrf.mxu1 }
  0xf0   :  { %v772_v15 = vadd.f32 %v2518_v13, %v2810_v52  ;;  %v403_v16 = vpop.f32.mrf.mxu0 }
  0xf1   :  { %v1971_v18 = vpack.c.bf16 %v412_v12, %v409_v11  ;;  %v404_v19 = vadd.f32 %v2805_v50, %v403_v16  ;;  %v763_v20 = vpop.f32.mrf.mxu1 }
  0xf2   :  { %v2131_v22 = vpack.c.bf16 %v772_v15, %v769_v14  ;;  %v764_v23 = vadd.f32 %v2810_v52, %v763_v20  ;;  %v2441_v24 = vpop.f32.mrf.mxu0 }
  0xf3   :  { %2275 = vst [vmem:[%s3137_s5 + $0x18] sm:$0xff] %v1971_v18   ;;  %v1966_v25 = vpack.c.bf16 %v404_v19, %v401_v17  ;;  %v2521_v26 = vpop.f32.mrf.mxu1  ;;  %v425_v31 = vadd.f32 %v2441_v24, %v2805_v50 }
  0xf4   :  { %2306 = vst [vmem:[%s3138_s6 + $0x18] sm:$0xff] %v2131_v22   ;;  %v2126_v27 = vpack.c.bf16 %v764_v23, %v761_v21  ;;  %v416_v28 = vpop.f32.mrf.mxu0  ;;  %v785_v34 = vadd.f32 %v2521_v26, %v2810_v52 }
  0xf5   :  { %2274 = vst [vmem:[%s3137_s5 + $0x10] sm:$0xff] %v1966_v25   ;;  %v776_v29 = vpop.f32.mrf.mxu1  ;;  %v417_v37 = vadd.f32 %v2805_v50, %v416_v28 }
  0xf6   :  { %2305 = vst [vmem:[%s3138_s6 + $0x10] sm:$0xff] %v2126_v27   ;;  %v2442_v30 = vpop.f32.mrf.mxu0  ;;  %v777_v41 = vadd.f32 %v2810_v52, %v776_v29 }
  0xf7   :  { %v428_v32 = vadd.f32 %v2442_v30, %v2805_v50  ;;  %v2522_v33 = vpop.f32.mrf.mxu1 }
  0xf8   :  { %v788_v35 = vadd.f32 %v2522_v33, %v2810_v52  ;;  %v419_v36 = vpop.f32.mrf.mxu0 }
  0xf9   :  { %v1981_v38 = vpack.c.bf16 %v428_v32, %v425_v31  ;;  %v420_v39 = vadd.f32 %v2805_v50, %v419_v36  ;;  %v779_v40 = vpop.f32.mrf.mxu1 }
  0xfa   :  { %v2141_v42 = vpack.c.bf16 %v788_v35, %v785_v34  ;;  %v780_v43 = vadd.f32 %v2810_v52, %v779_v40  ;;  %v2445_v44 = vpop.f32.mrf.mxu0 }
  0xfb   :  { %2277 = vst [vmem:[%s3137_s5 + $0x28] sm:$0xff] %v1981_v38   ;;  %v1976_v45 = vpack.c.bf16 %v420_v39, %v417_v37  ;;  %v2525_v46 = vpop.f32.mrf.mxu1  ;;  %v441_v53 = vadd.f32 %v2445_v44, %v2805_v50 }
  0xfc   :  { %2308 = vst [vmem:[%s3138_s6 + $0x28] sm:$0xff] %v2141_v42   ;;  %v2136_v47 = vpack.c.bf16 %v780_v43, %v777_v41  ;;  %v432_v48 = vpop.f32.mrf.mxu0  ;;  %v801_v56 = vadd.f32 %v2525_v46, %v2810_v52 }
  0xfd   :  { %2276 = vst [vmem:[%s3137_s5 + $0x20] sm:$0xff] %v1976_v45   ;;  %v792_v49 = vpop.f32.mrf.mxu1  ;;  %v433_v59 = vadd.f32 %v2805_v50, %v432_v48 }
  0xfe   :  { %2307 = vst [vmem:[%s3138_s6 + $0x20] sm:$0xff] %v2136_v47   ;;  %v2446_v51 = vpop.f32.mrf.mxu0  ;;  %v793_v63 = vadd.f32 %v2810_v52, %v792_v49 }
  0xff   :  { %v444_v54 = vadd.f32 %v2446_v51, %v2805_v50  ;;  %v2526_v55 = vpop.f32.mrf.mxu1 }
 0x100   :  { %v804_v57 = vadd.f32 %v2526_v55, %v2810_v52  ;;  %v435_v58 = vpop.f32.mrf.mxu0 }
 0x101   :  { %v1991_v60 = vpack.c.bf16 %v444_v54, %v441_v53  ;;  %v436_v61 = vadd.f32 %v2805_v50, %v435_v58  ;;  %v795_v62 = vpop.f32.mrf.mxu1 }
 0x102   :  { %v2151_v0 = vpack.c.bf16 %v804_v57, %v801_v56  ;;  %v796_v1 = vadd.f32 %v2810_v52, %v795_v62  ;;  %v2449_v2 = vpop.f32.mrf.mxu0 }
 0x103   :  { %2279 = vst [vmem:[%s3137_s5 + $0x38] sm:$0xff] %v1991_v60   ;;  %v1986_v3 = vpack.c.bf16 %v436_v61, %v433_v59  ;;  %v2529_v4 = vpop.f32.mrf.mxu1  ;;  %v457_v9 = vadd.f32 %v2449_v2, %v2805_v50 }
 0x104   :  { %2310 = vst [vmem:[%s3138_s6 + $0x38] sm:$0xff] %v2151_v0   ;;  %v2146_v5 = vpack.c.bf16 %v796_v1, %v793_v63  ;;  %v448_v6 = vpop.f32.mrf.mxu0  ;;  %v817_v12 = vadd.f32 %v2529_v4, %v2810_v52 }
 0x105   :  { %2278 = vst [vmem:[%s3137_s5 + $0x30] sm:$0xff] %v1986_v3   ;;  %v808_v7 = vpop.f32.mrf.mxu1  ;;  %v449_v15 = vadd.f32 %v2805_v50, %v448_v6 }
 0x106   :  { %2309 = vst [vmem:[%s3138_s6 + $0x30] sm:$0xff] %v2146_v5   ;;  %v2450_v8 = vpop.f32.mrf.mxu0  ;;  %v809_v19 = vadd.f32 %v2810_v52, %v808_v7 }
 0x107   :  { %v460_v10 = vadd.f32 %v2450_v8, %v2805_v50  ;;  %v2530_v11 = vpop.f32.mrf.mxu1 }
 0x108   :  { %v820_v13 = vadd.f32 %v2530_v11, %v2810_v52  ;;  %v451_v14 = vpop.f32.mrf.mxu0 }
 0x109   :  { %v2001_v16 = vpack.c.bf16 %v460_v10, %v457_v9  ;;  %v452_v17 = vadd.f32 %v2805_v50, %v451_v14  ;;  %v811_v18 = vpop.f32.mrf.mxu1 }
 0x10a   :  { %v2161_v20 = vpack.c.bf16 %v820_v13, %v817_v12  ;;  %v812_v21 = vadd.f32 %v2810_v52, %v811_v18  ;;  %v2453_v22 = vpop.f32.mrf.mxu0 }
 0x10b   :  { %2281 = vst [vmem:[%s3137_s5 + $0x48] sm:$0xff] %v2001_v16   ;;  %v1996_v23 = vpack.c.bf16 %v452_v17, %v449_v15  ;;  %v2533_v24 = vpop.f32.mrf.mxu1  ;;  %v473_v29 = vadd.f32 %v2453_v22, %v2805_v50 }
 0x10c   :  { %2312 = vst [vmem:[%s3138_s6 + $0x48] sm:$0xff] %v2161_v20   ;;  %v2156_v25 = vpack.c.bf16 %v812_v21, %v809_v19  ;;  %v464_v26 = vpop.f32.mrf.mxu0  ;;  %v833_v32 = vadd.f32 %v2533_v24, %v2810_v52 }
 0x10d   :  { %2280 = vst [vmem:[%s3137_s5 + $0x40] sm:$0xff] %v1996_v23   ;;  %v824_v27 = vpop.f32.mrf.mxu1  ;;  %v465_v35 = vadd.f32 %v2805_v50, %v464_v26 }
 0x10e   :  { %2311 = vst [vmem:[%s3138_s6 + $0x40] sm:$0xff] %v2156_v25   ;;  %v2454_v28 = vpop.f32.mrf.mxu0  ;;  %v825_v39 = vadd.f32 %v2810_v52, %v824_v27 }
 0x10f   :  { %v476_v30 = vadd.f32 %v2454_v28, %v2805_v50  ;;  %v2534_v31 = vpop.f32.mrf.mxu1 }
 0x110   :  { %v836_v33 = vadd.f32 %v2534_v31, %v2810_v52  ;;  %v467_v34 = vpop.f32.mrf.mxu0 }
 0x111   :  { %v2011_v36 = vpack.c.bf16 %v476_v30, %v473_v29  ;;  %v468_v37 = vadd.f32 %v2805_v50, %v467_v34  ;;  %v827_v38 = vpop.f32.mrf.mxu1 }
 0x112   :  { %v2171_v40 = vpack.c.bf16 %v836_v33, %v833_v32  ;;  %v828_v41 = vadd.f32 %v2810_v52, %v827_v38  ;;  %v2457_v42 = vpop.f32.mrf.mxu0 }
 0x113   :  { %2283 = vst [vmem:[%s3137_s5 + $0x58] sm:$0xff] %v2011_v36   ;;  %v2006_v43 = vpack.c.bf16 %v468_v37, %v465_v35  ;;  %v2537_v44 = vpop.f32.mrf.mxu1  ;;  %v489_v49 = vadd.f32 %v2457_v42, %v2805_v50 }
 0x114   :  { %2314 = vst [vmem:[%s3138_s6 + $0x58] sm:$0xff] %v2171_v40   ;;  %v2166_v45 = vpack.c.bf16 %v828_v41, %v825_v39  ;;  %v480_v46 = vpop.f32.mrf.mxu0  ;;  %v849_v54 = vadd.f32 %v2537_v44, %v2810_v52 }
 0x115   :  { %2282 = vst [vmem:[%s3137_s5 + $0x50] sm:$0xff] %v2006_v43   ;;  %v840_v47 = vpop.f32.mrf.mxu1  ;;  %v481_v57 = vadd.f32 %v2805_v50, %v480_v46 }
 0x116   :  { %2313 = vst [vmem:[%s3138_s6 + $0x50] sm:$0xff] %v2166_v45   ;;  %v2458_v48 = vpop.f32.mrf.mxu0  ;;  %v841_v61 = vadd.f32 %v2810_v52, %v840_v47 }
 0x117   :  { %v492_v51 = vadd.f32 %v2458_v48, %v2805_v50  ;;  %v2538_v53 = vpop.f32.mrf.mxu1 }
 0x118   :  { %v852_v55 = vadd.f32 %v2538_v53, %v2810_v52  ;;  %v483_v56 = vpop.f32.mrf.mxu0 }
 0x119   :  { %v2021_v58 = vpack.c.bf16 %v492_v51, %v489_v49  ;;  %v484_v59 = vadd.f32 %v2805_v50, %v483_v56  ;;  %v843_v60 = vpop.f32.mrf.mxu1 }
 0x11a   :  { %v2181_v62 = vpack.c.bf16 %v852_v55, %v849_v54  ;;  %v844_v63 = vadd.f32 %v2810_v52, %v843_v60  ;;  %v2461_v0 = vpop.f32.mrf.mxu0 }
 0x11b   :  { %2285 = vst [vmem:[%s3137_s5 + $0x68] sm:$0xff] %v2021_v58   ;;  %v2016_v1 = vpack.c.bf16 %v484_v59, %v481_v57  ;;  %v2541_v2 = vpop.f32.mrf.mxu1  ;;  %v505_v7 = vadd.f32 %v2461_v0, %v2805_v50 }
 0x11c   :  { %2316 = vst [vmem:[%s3138_s6 + $0x68] sm:$0xff] %v2181_v62   ;;  %v2176_v3 = vpack.c.bf16 %v844_v63, %v841_v61  ;;  %v496_v4 = vpop.f32.mrf.mxu0  ;;  %v865_v10 = vadd.f32 %v2541_v2, %v2810_v52 }
 0x11d   :  { %2284 = vst [vmem:[%s3137_s5 + $0x60] sm:$0xff] %v2016_v1   ;;  %v856_v5 = vpop.f32.mrf.mxu1  ;;  %v497_v13 = vadd.f32 %v2805_v50, %v496_v4 }
 0x11e   :  { %2315 = vst [vmem:[%s3138_s6 + $0x60] sm:$0xff] %v2176_v3   ;;  %v2462_v6 = vpop.f32.mrf.mxu0  ;;  %v857_v17 = vadd.f32 %v2810_v52, %v856_v5 }
 0x11f   :  { %v508_v8 = vadd.f32 %v2462_v6, %v2805_v50  ;;  %v2542_v9 = vpop.f32.mrf.mxu1 }
 0x120   :  { %v868_v11 = vadd.f32 %v2542_v9, %v2810_v52  ;;  %v499_v12 = vpop.f32.mrf.mxu0 }
 0x121   :  { %v2031_v14 = vpack.c.bf16 %v508_v8, %v505_v7  ;;  %v500_v15 = vadd.f32 %v2805_v50, %v499_v12  ;;  %v859_v16 = vpop.f32.mrf.mxu1 }
 0x122   :  { %v2191_v18 = vpack.c.bf16 %v868_v11, %v865_v10  ;;  %v860_v19 = vadd.f32 %v2810_v52, %v859_v16  ;;  %v2465_v20 = vpop.f32.mrf.mxu0 }
 0x123   :  { %2287 = vst [vmem:[%s3137_s5 + $0x78] sm:$0xff] %v2031_v14   ;;  %v2026_v21 = vpack.c.bf16 %v500_v15, %v497_v13  ;;  %v2545_v22 = vpop.f32.mrf.mxu1  ;;  %v521_v27 = vadd.f32 %v2465_v20, %v2805_v50 }
 0x124   :  { %2318 = vst [vmem:[%s3138_s6 + $0x78] sm:$0xff] %v2191_v18   ;;  %v2186_v23 = vpack.c.bf16 %v860_v19, %v857_v17  ;;  %v512_v24 = vpop.f32.mrf.mxu0  ;;  %v881_v30 = vadd.f32 %v2545_v22, %v2810_v52 }
 0x125   :  { %2286 = vst [vmem:[%s3137_s5 + $0x70] sm:$0xff] %v2026_v21   ;;  %v872_v25 = vpop.f32.mrf.mxu1  ;;  %v513_v33 = vadd.f32 %v2805_v50, %v512_v24 }
 0x126   :  { %2317 = vst [vmem:[%s3138_s6 + $0x70] sm:$0xff] %v2186_v23   ;;  %v2466_v26 = vpop.f32.mrf.mxu0  ;;  %v873_v37 = vadd.f32 %v2810_v52, %v872_v25 }
 0x127   :  { %v524_v28 = vadd.f32 %v2466_v26, %v2805_v50  ;;  %v2546_v29 = vpop.f32.mrf.mxu1 }
 0x128   :  { %v884_v31 = vadd.f32 %v2546_v29, %v2810_v52  ;;  %v515_v32 = vpop.f32.mrf.mxu0 }
 0x129   :  { %v2041_v34 = vpack.c.bf16 %v524_v28, %v521_v27  ;;  %v516_v35 = vadd.f32 %v2805_v50, %v515_v32  ;;  %v875_v36 = vpop.f32.mrf.mxu1 }
 0x12a   :  { %v2201_v38 = vpack.c.bf16 %v884_v31, %v881_v30  ;;  %v876_v39 = vadd.f32 %v2810_v52, %v875_v36  ;;  %v2469_v40 = vpop.f32.mrf.mxu0 }
 0x12b   :  { %2289 = vst [vmem:[%s3137_s5 + $0x88] sm:$0xff] %v2041_v34   ;;  %v2036_v41 = vpack.c.bf16 %v516_v35, %v513_v33  ;;  %v2549_v42 = vpop.f32.mrf.mxu1  ;;  %v537_v47 = vadd.f32 %v2469_v40, %v2805_v50 }
 0x12c   :  { %2320 = vst [vmem:[%s3138_s6 + $0x88] sm:$0xff] %v2201_v38   ;;  %v2196_v43 = vpack.c.bf16 %v876_v39, %v873_v37  ;;  %v528_v44 = vpop.f32.mrf.mxu0  ;;  %v897_v51 = vadd.f32 %v2549_v42, %v2810_v52 }
 0x12d   :  { %2288 = vst [vmem:[%s3137_s5 + $0x80] sm:$0xff] %v2036_v41   ;;  %v888_v45 = vpop.f32.mrf.mxu1  ;;  %v529_v55 = vadd.f32 %v2805_v50, %v528_v44 }
 0x12e   :  { %2319 = vst [vmem:[%s3138_s6 + $0x80] sm:$0xff] %v2196_v43   ;;  %v2470_v46 = vpop.f32.mrf.mxu0  ;;  %v889_v59 = vadd.f32 %v2810_v52, %v888_v45 }
 0x12f   :  { %v540_v48 = vadd.f32 %v2470_v46, %v2805_v50  ;;  %v2550_v49 = vpop.f32.mrf.mxu1 }
 0x130   :  { %v900_v53 = vadd.f32 %v2550_v49, %v2810_v52  ;;  %v531_v54 = vpop.f32.mrf.mxu0 }
 0x131   :  { %v2051_v56 = vpack.c.bf16 %v540_v48, %v537_v47  ;;  %v532_v57 = vadd.f32 %v2805_v50, %v531_v54  ;;  %v891_v58 = vpop.f32.mrf.mxu1 }
 0x132   :  { %v2211_v60 = vpack.c.bf16 %v900_v53, %v897_v51  ;;  %v892_v61 = vadd.f32 %v2810_v52, %v891_v58  ;;  %v2473_v62 = vpop.f32.mrf.mxu0 }
 0x133   :  { %2291 = vst [vmem:[%s3137_s5 + $0x98] sm:$0xff] %v2051_v56   ;;  %v2046_v63 = vpack.c.bf16 %v532_v57, %v529_v55  ;;  %v2553_v0 = vpop.f32.mrf.mxu1  ;;  %v553_v5 = vadd.f32 %v2473_v62, %v2805_v50 }
 0x134   :  { %2322 = vst [vmem:[%s3138_s6 + $0x98] sm:$0xff] %v2211_v60   ;;  %v2206_v1 = vpack.c.bf16 %v892_v61, %v889_v59  ;;  %v544_v2 = vpop.f32.mrf.mxu0  ;;  %v913_v8 = vadd.f32 %v2553_v0, %v2810_v52 }
 0x135   :  { %2290 = vst [vmem:[%s3137_s5 + $0x90] sm:$0xff] %v2046_v63   ;;  %v904_v3 = vpop.f32.mrf.mxu1  ;;  %v545_v11 = vadd.f32 %v2805_v50, %v544_v2 }
 0x136   :  { %2321 = vst [vmem:[%s3138_s6 + $0x90] sm:$0xff] %v2206_v1   ;;  %v2474_v4 = vpop.f32.mrf.mxu0  ;;  %v905_v15 = vadd.f32 %v2810_v52, %v904_v3 }
 0x137   :  { %v556_v6 = vadd.f32 %v2474_v4, %v2805_v50  ;;  %v2554_v7 = vpop.f32.mrf.mxu1 }
 0x138   :  { %v916_v9 = vadd.f32 %v2554_v7, %v2810_v52  ;;  %v547_v10 = vpop.f32.mrf.mxu0 }
 0x139   :  { %v2061_v12 = vpack.c.bf16 %v556_v6, %v553_v5  ;;  %v548_v13 = vadd.f32 %v2805_v50, %v547_v10  ;;  %v907_v14 = vpop.f32.mrf.mxu1 }
 0x13a   :  { %v2221_v16 = vpack.c.bf16 %v916_v9, %v913_v8  ;;  %v908_v17 = vadd.f32 %v2810_v52, %v907_v14  ;;  %v2477_v18 = vpop.f32.mrf.mxu0 }
 0x13b   :  { %2293 = vst [vmem:[%s3137_s5 + $0xa8] sm:$0xff] %v2061_v12   ;;  %v2056_v19 = vpack.c.bf16 %v548_v13, %v545_v11  ;;  %v2557_v20 = vpop.f32.mrf.mxu1  ;;  %v569_v25 = vadd.f32 %v2477_v18, %v2805_v50 }
 0x13c   :  { %2324 = vst [vmem:[%s3138_s6 + $0xa8] sm:$0xff] %v2221_v16   ;;  %v2216_v21 = vpack.c.bf16 %v908_v17, %v905_v15  ;;  %v560_v22 = vpop.f32.mrf.mxu0  ;;  %v929_v28 = vadd.f32 %v2557_v20, %v2810_v52 }
 0x13d   :  { %2292 = vst [vmem:[%s3137_s5 + $0xa0] sm:$0xff] %v2056_v19   ;;  %v920_v23 = vpop.f32.mrf.mxu1  ;;  %v561_v31 = vadd.f32 %v2805_v50, %v560_v22 }
 0x13e   :  { %2323 = vst [vmem:[%s3138_s6 + $0xa0] sm:$0xff] %v2216_v21   ;;  %v2478_v24 = vpop.f32.mrf.mxu0  ;;  %v921_v35 = vadd.f32 %v2810_v52, %v920_v23 }
 0x13f   :  { %v572_v26 = vadd.f32 %v2478_v24, %v2805_v50  ;;  %v2558_v27 = vpop.f32.mrf.mxu1 }
 0x140   :  { %v932_v29 = vadd.f32 %v2558_v27, %v2810_v52  ;;  %v563_v30 = vpop.f32.mrf.mxu0 }
 0x141   :  { %v2071_v32 = vpack.c.bf16 %v572_v26, %v569_v25  ;;  %v564_v33 = vadd.f32 %v2805_v50, %v563_v30  ;;  %v923_v34 = vpop.f32.mrf.mxu1 }
 0x142   :  { %v2231_v36 = vpack.c.bf16 %v932_v29, %v929_v28  ;;  %v924_v37 = vadd.f32 %v2810_v52, %v923_v34  ;;  %v2481_v38 = vpop.f32.mrf.mxu0 }
 0x143   :  { %2295 = vst [vmem:[%s3137_s5 + $0xb8] sm:$0xff] %v2071_v32   ;;  %v2066_v39 = vpack.c.bf16 %v564_v33, %v561_v31  ;;  %v2561_v40 = vpop.f32.mrf.mxu1  ;;  %v585_v45 = vadd.f32 %v2481_v38, %v2805_v50 }
 0x144   :  { %2326 = vst [vmem:[%s3138_s6 + $0xb8] sm:$0xff] %v2231_v36   ;;  %v2226_v41 = vpack.c.bf16 %v924_v37, %v921_v35  ;;  %v576_v42 = vpop.f32.mrf.mxu0  ;;  %v945_v48 = vadd.f32 %v2561_v40, %v2810_v52 }
 0x145   :  { %2294 = vst [vmem:[%s3137_s5 + $0xb0] sm:$0xff] %v2066_v39   ;;  %v936_v43 = vpop.f32.mrf.mxu1  ;;  %v577_v53 = vadd.f32 %v2805_v50, %v576_v42 }
 0x146   :  { %2325 = vst [vmem:[%s3138_s6 + $0xb0] sm:$0xff] %v2226_v41   ;;  %v2482_v44 = vpop.f32.mrf.mxu0  ;;  %v937_v57 = vadd.f32 %v2810_v52, %v936_v43 }
 0x147   :  { %v588_v46 = vadd.f32 %v2482_v44, %v2805_v50  ;;  %v2562_v47 = vpop.f32.mrf.mxu1 }
 0x148   :  { %v948_v49 = vadd.f32 %v2562_v47, %v2810_v52  ;;  %v579_v51 = vpop.f32.mrf.mxu0 }
 0x149   :  { %v2081_v54 = vpack.c.bf16 %v588_v46, %v585_v45  ;;  %v580_v55 = vadd.f32 %v2805_v50, %v579_v51  ;;  %v939_v56 = vpop.f32.mrf.mxu1 }
 0x14a   :  { %v2241_v58 = vpack.c.bf16 %v948_v49, %v945_v48  ;;  %v940_v59 = vadd.f32 %v2810_v52, %v939_v56  ;;  %v2485_v60 = vpop.f32.mrf.mxu0 }
 0x14b   :  { %2297 = vst [vmem:[%s3137_s5 + $0xc8] sm:$0xff] %v2081_v54   ;;  %v2076_v61 = vpack.c.bf16 %v580_v55, %v577_v53  ;;  %v2565_v62 = vpop.f32.mrf.mxu1  ;;  %v601_v3 = vadd.f32 %v2485_v60, %v2805_v50 }
 0x14c   :  { %2328 = vst [vmem:[%s3138_s6 + $0xc8] sm:$0xff] %v2241_v58   ;;  %v2236_v63 = vpack.c.bf16 %v940_v59, %v937_v57  ;;  %v592_v0 = vpop.f32.mrf.mxu0  ;;  %v961_v6 = vadd.f32 %v2565_v62, %v2810_v52 }
 0x14d   :  { %2296 = vst [vmem:[%s3137_s5 + $0xc0] sm:$0xff] %v2076_v61   ;;  %v952_v1 = vpop.f32.mrf.mxu1  ;;  %v593_v9 = vadd.f32 %v2805_v50, %v592_v0 }
 0x14e   :  { %2327 = vst [vmem:[%s3138_s6 + $0xc0] sm:$0xff] %v2236_v63   ;;  %v2486_v2 = vpop.f32.mrf.mxu0  ;;  %v953_v13 = vadd.f32 %v2810_v52, %v952_v1 }
 0x14f   :  { %v604_v4 = vadd.f32 %v2486_v2, %v2805_v50  ;;  %v2566_v5 = vpop.f32.mrf.mxu1 }
 0x150   :  { %v964_v7 = vadd.f32 %v2566_v5, %v2810_v52  ;;  %v595_v8 = vpop.f32.mrf.mxu0 }
 0x151   :  { %v2091_v10 = vpack.c.bf16 %v604_v4, %v601_v3  ;;  %v596_v11 = vadd.f32 %v2805_v50, %v595_v8  ;;  %v955_v12 = vpop.f32.mrf.mxu1 }
 0x152   :  { %v2251_v14 = vpack.c.bf16 %v964_v7, %v961_v6  ;;  %v956_v15 = vadd.f32 %v2810_v52, %v955_v12  ;;  %v2489_v16 = vpop.f32.mrf.mxu0 }
 0x153   :  { %2299 = vst [vmem:[%s3137_s5 + $0xd8] sm:$0xff] %v2091_v10   ;;  %v2086_v17 = vpack.c.bf16 %v596_v11, %v593_v9  ;;  %v2569_v18 = vpop.f32.mrf.mxu1  ;;  %v617_v23 = vadd.f32 %v2489_v16, %v2805_v50 }
 0x154   :  { %2330 = vst [vmem:[%s3138_s6 + $0xd8] sm:$0xff] %v2251_v14   ;;  %v2246_v19 = vpack.c.bf16 %v956_v15, %v953_v13  ;;  %v608_v20 = vpop.f32.mrf.mxu0  ;;  %v977_v26 = vadd.f32 %v2569_v18, %v2810_v52 }
 0x155   :  { %2298 = vst [vmem:[%s3137_s5 + $0xd0] sm:$0xff] %v2086_v17   ;;  %v968_v21 = vpop.f32.mrf.mxu1  ;;  %v609_v29 = vadd.f32 %v2805_v50, %v608_v20 }
 0x156   :  { %2329 = vst [vmem:[%s3138_s6 + $0xd0] sm:$0xff] %v2246_v19   ;;  %v2490_v22 = vpop.f32.mrf.mxu0  ;;  %v969_v33 = vadd.f32 %v2810_v52, %v968_v21 }
 0x157   :  { %v620_v24 = vadd.f32 %v2490_v22, %v2805_v50  ;;  %v2570_v25 = vpop.f32.mrf.mxu1 }
 0x158   :  { %v980_v27 = vadd.f32 %v2570_v25, %v2810_v52  ;;  %v611_v28 = vpop.f32.mrf.mxu0 }
 0x159   :  { %v2101_v30 = vpack.c.bf16 %v620_v24, %v617_v23  ;;  %v612_v31 = vadd.f32 %v2805_v50, %v611_v28  ;;  %v971_v32 = vpop.f32.mrf.mxu1 }
 0x15a   :  { %v2261_v34 = vpack.c.bf16 %v980_v27, %v977_v26  ;;  %v972_v35 = vadd.f32 %v2810_v52, %v971_v32  ;;  %v2493_v36 = vpop.f32.mrf.mxu0 }
 0x15b   :  { %2301 = vst [vmem:[%s3137_s5 + $0xe8] sm:$0xff] %v2101_v30   ;;  %v2096_v37 = vpack.c.bf16 %v612_v31, %v609_v29  ;;  %v2573_v38 = vpop.f32.mrf.mxu1  ;;  %v633_v43 = vadd.f32 %v2493_v36, %v2805_v50 }
 0x15c   :  { %2332 = vst [vmem:[%s3138_s6 + $0xe8] sm:$0xff] %v2261_v34   ;;  %v2256_v39 = vpack.c.bf16 %v972_v35, %v969_v33  ;;  %v624_v40 = vpop.f32.mrf.mxu0  ;;  %v993_v46 = vadd.f32 %v2573_v38, %v2810_v52 }
 0x15d   :  { %2300 = vst [vmem:[%s3137_s5 + $0xe0] sm:$0xff] %v2096_v37   ;;  %v984_v41 = vpop.f32.mrf.mxu1  ;;  %v625_v49 = vadd.f32 %v2805_v50, %v624_v40 }
 0x15e   :  { %2331 = vst [vmem:[%s3138_s6 + $0xe0] sm:$0xff] %v2256_v39   ;;  %v2494_v42 = vpop.f32.mrf.mxu0  ;;  %v985_v55 = vadd.f32 %v2810_v52, %v984_v41 }
 0x15f   :  { %v636_v44 = vadd.f32 %v2494_v42, %v2805_v50  ;;  %v2574_v45 = vpop.f32.mrf.mxu1 }
 0x160   :  { %v996_v47 = vadd.f32 %v2574_v45, %v2810_v52  ;;  %v627_v48 = vpop.f32.mrf.mxu0 }
 0x161   :  { %v2111_v51 = vpack.c.bf16 %v636_v44, %v633_v43  ;;  %v628_v53 = vadd.f32 %v2805_v50, %v627_v48  ;;  %v987_v54 = vpop.f32.mrf.mxu1 }
 0x162   :  { %v2271_v56 = vpack.c.bf16 %v996_v47, %v993_v46  ;;  %v988_v57 = vadd.f32 %v2810_v52, %v987_v54 }
 0x163   :  { %2303 = vst [vmem:[%s3137_s5 + $0xf8] sm:$0xff] %v2111_v51   ;;  %v2106_v58 = vpack.c.bf16 %v628_v53, %v625_v49 }
 0x164   :  { %2334 = vst [vmem:[%s3138_s6 + $0xf8] sm:$0xff] %v2271_v56   ;;  %v2266_v59 = vpack.c.bf16 %v988_v57, %v985_v55 }
 0x165   :  { %2302 = vst [vmem:[%s3137_s5 + $0xf0] sm:$0xff] %v2106_v58  }
 0x166   :  { %2333 = vst [vmem:[%s3138_s6 + $0xf0] sm:$0xff] %v2266_v59  }

// kernel: cross_view_transformer_forward.6
= control target key start
LH: loop header
LB: loop body
LE: loop exit
PB: predicated region body
PF: predicated region fallthrough
CT: control target
= control target key end

     0   :  { %s1635_s18 = smov 0   ;;  %s1637_s19 = smov 0   ;;  %s1888_s0 = inlined_call_operand.vmem [shape: bf16[1,64,128], index: 0, kind: input, shape index: {}]   ;;  %s1889_s1 = inlined_call_operand.vmem [shape: bf16[4,128,128], index: 1, kind: input, shape index: {}]   ;;  %s1890_s2 = inlined_call_operand.vmem [shape: bf16[4,128,128], index: 2, kind: input, shape index: {}]   ;;  %s1891_s3 = inlined_call_operand.vmem [shape: bf16[128,128], index: 3, kind: input, shape index: {}]   ;;  %s1892_s4 = inlined_call_operand.vmem [shape: f32[1,128], index: 4, kind: input, shape index: {}]   ;;  %s1893_s5 = inlined_call_operand.vmem [shape: bf16[4,64,128], index: 5, kind: output, shape index: {}]  }
   0x1   :  { %s1639_s20 = smov 0  }
   0x2 LB: > { %s34_s21 = sadd.s32 1, %s1596_s19  ;;  %p1285_p0 = scmp.ge.s32.totalorder %s1600_s20, 1  ;;  %s1600_s20 = sphi %s1639_s20, %s15_s20   ;;  %s1596_s19 = sphi %s1637_s19, %s1895_s19   ;;  %s1592_s18 = sphi %s1635_s18, %s1894_s18  }
   0x3   : > { %p36_p1 = scmp.ge.s32.totalorder %s34_s21, 4  ;;  %p243_p2 = scmp.lt.s32.totalorder %s1600_s20, 5 }
   0x5   : > { %s1897_s21 = smov (%p36_p1, %s34_s21), 0  ;;  %p244_p3 = pnand %p1285_p0, %p243_p2 }
   0x6   : > { %p300_p4 = scmp.lt.s32.totalorder (!%p244_p3), %s1592_s18, 3 }
   0x7   : > { %247 = sbr.rel (%p244_p3) target bundleno = 1077 (0x435), region = 40 }
   0xc   : > { %v1510_v0 = vld [vmem:[%s1888_s0] sm:$0xff]   ;;  %s1899_s18 = smov (!%p300_p4, %s1592_s18), 3  ;;  %v1511_v9 = vld [vmem:[%s1888_s0 + $0x8] sm:$0xff]   ;;  %v1512_v10 = vld [vmem:[%s1888_s0 + $0x10] sm:$0xff]   ;;  %vm334_vm0 = vcmask 7168   ;;  %v1602_v12 = vmov -inf  }
   0xd   : > { %1417 = vmatprep.mubr.bf16.mxu0 %v1510_v0  ;;  %s1331_s24 = sshll.u32 %s1899_s18, 6  ;;  %v1513_v11 = vld [vmem:[%s1888_s0 + $0x18] sm:$0xff]   ;;  %337 = vst.msk [vmem:[#allocation2 + $0x10] sm:$0xff] %vm334_vm0, %v1602_v12  ;;  %335 = vst.msk [vmem:[#allocation2] sm:$0xff] %vm334_vm0, %v1602_v12  ;;  %v1603_v20 = vmov 0   ;;  %v1604_v22 = vmov 0.0  }
   0xe   : > { %s307_s27 = scalar_lea.vmem %s1889_s1, %s1331_s24  ;;  %336 = vst.msk [vmem:[#allocation2 + $0x8] sm:$0xff] %vm334_vm0, %v1602_v12  ;;  %338 = vst.msk [vmem:[#allocation2 + $0x18] sm:$0xff] %vm334_vm0, %v1602_v12  ;;  %1501 = vset.pattern.permute.xlu1 %v1603_v20  ;;  %1500 = vset.pattern.permute.xlu0 %v1603_v20  ;;  %s1718_s11 = scalar_lea.vmem %s1890_s2, %s1331_s24 }
   0xf   : > { %v1502_v1 = vld [vmem:[%s307_s27 + $0x38] sm:$0xff]   ;;  %v1503_v2 = vld [vmem:[%s307_s27 + $0x30] sm:$0xff]   ;;  %v1504_v3 = vld [vmem:[%s307_s27 + $0x28] sm:$0xff]   ;;  %339 = vst.msk [vmem:[#allocation2 + $0x20] sm:$0xff] %vm334_vm0, %v1602_v12  ;;  %s1333_s9 = sshll.u32 %s1899_s18, 5 }
  0x10   : > { %1401 = vmatprep.subr.bf16.mxu0 %v1502_v1  ;;  %v1505_v4 = vld [vmem:[%s307_s27 + $0x20] sm:$0xff]   ;;  %v1506_v5 = vld [vmem:[%s307_s27 + $0x18] sm:$0xff]   ;;  %v1507_v6 = vld [vmem:[%s307_s27 + $0x10] sm:$0xff]   ;;  %340 = vst.msk [vmem:[#allocation2 + $0x28] sm:$0xff] %vm334_vm0, %v1602_v12  ;;  %s327_s12 = scalar_lea.vmem %s1893_s5, %s1333_s9 }
  0x11   : > { %1402 = vmatpush3.bf16.xpose.msra.mxu0 %v1502_v1  ;;  %v1508_v7 = vld [vmem:[%s307_s27 + $0x8] sm:$0xff]   ;;  %v1509_v8 = vld [vmem:[%s307_s27] sm:$0xff]   ;;  %341 = vst.msk [vmem:[#allocation2 + $0x30] sm:$0xff] %vm334_vm0, %v1602_v12  ;;  %342 = vst.msk [vmem:[#allocation2 + $0x38] sm:$0xff] %vm334_vm0, %v1602_v12 }
  0x12   : > { %1403 = vmatprep.subr.bf16.mxu0 %v1503_v2  ;;  %343 = vst.msk [vmem:[#allocation3] sm:$0xff] %vm334_vm0, %v1604_v22  ;;  %344 = vst.msk [vmem:[#allocation3 + $0x8] sm:$0xff] %vm334_vm0, %v1604_v22  ;;  %v1514_v23 = vld [vmem:[%s1718_s11 + $0x38] sm:$0xff]   ;;  %v1515_v25 = vld [vmem:[%s1718_s11 + $0x30] sm:$0xff]  }
  0x13   : > { %345 = vst.msk [vmem:[#allocation3 + $0x10] sm:$0xff] %vm334_vm0, %v1604_v22  ;;  %346 = vst.msk [vmem:[#allocation3 + $0x18] sm:$0xff] %vm334_vm0, %v1604_v22  ;;  %1425 = vmatprep.subr.bf16.mxu1 %v1514_v23  ;;  %v1516_v33 = vld [vmem:[%s1718_s11 + $0x28] sm:$0xff]   ;;  %v1517_v41 = vld [vmem:[%s1718_s11 + $0x20] sm:$0xff]  }
  0x14   : > { %347 = vst.msk [vmem:[#allocation3 + $0x20] sm:$0xff] %vm334_vm0, %v1604_v22  ;;  %348 = vst.msk [vmem:[#allocation3 + $0x28] sm:$0xff] %vm334_vm0, %v1604_v22  ;;  %1426 = vmatpush3.bf16.msra.mxu1 %v1514_v23  ;;  %v1721_v24 = vld [vmem:[#allocation2 + $0x10] sm:$0xff]  ;;  %v1724_v27 = vld [vmem:[#allocation2] sm:$0xff] }
  0x15   : > { %349 = vst.msk [vmem:[#allocation3 + $0x30] sm:$0xff] %vm334_vm0, %v1604_v22  ;;  %350 = vst.msk [vmem:[#allocation3 + $0x38] sm:$0xff] %vm334_vm0, %v1604_v22  ;;  %1427 = vmatprep.subr.bf16.mxu1 %v1515_v25  ;;  %v1729_v30 = vld [vmem:[#allocation2 + $0x18] sm:$0xff]  ;;  %v1740_v35 = vld [vmem:[#allocation2 + $0x8] sm:$0xff] }
  0x16   : > { %v1759_v42 = vld [vmem:[#allocation2 + $0x20] sm:$0xff]  ;;  %v1518_v46 = vld [vmem:[%s1718_s11 + $0x18] sm:$0xff]   ;;  %v1519_v54 = vld [vmem:[%s1718_s11 + $0x10] sm:$0xff]  }
  0x17   : > { %v1772_v48 = vld [vmem:[#allocation2 + $0x28] sm:$0xff]  ;;  %v1521_v62 = vld [vmem:[%s1718_s11] sm:$0xff]  }
  0x18   : > { %1428 = vmatpush3.bf16.msra.mxu1 %v1515_v25  ;;  %v1770_v47 = vld [vmem:[#allocation2 + $0x30] sm:$0xff]  ;;  %v1785_v55 = vld [vmem:[#allocation2 + $0x38] sm:$0xff]  ;;  %v1520_v60 = vld [vmem:[%s1718_s11 + $0x8] sm:$0xff]  }
  0x19   : > { %1404 = vmatpush3.bf16.xpose.msra.mxu0 %v1503_v2  ;;  %1429 = vmatprep.subr.bf16.mxu1 %v1516_v33 }
  0x1a   : > { %1405 = vmatprep.subr.bf16.mxu0 %v1504_v3 }
  0x1c   : > { %1430 = vmatpush3.bf16.msra.mxu1 %v1516_v33 }
  0x1d   : > { %1431 = vmatprep.subr.bf16.mxu1 %v1517_v41 }
  0x20   : > { %1432 = vmatpush3.bf16.msra.mxu1 %v1517_v41 }
  0x21   : > { %1406 = vmatpush3.bf16.xpose.msra.mxu0 %v1504_v3  ;;  %1433 = vmatprep.subr.bf16.mxu1 %v1518_v46 }
  0x22   : > { %1407 = vmatprep.subr.bf16.mxu0 %v1505_v4 }
  0x24   : > { %1434 = vmatpush3.bf16.msra.mxu1 %v1518_v46 }
  0x25   : > { %1435 = vmatprep.subr.bf16.mxu1 %v1519_v54 }
  0x28   : > { %1436 = vmatpush3.bf16.msra.mxu1 %v1519_v54 }
  0x29   : > { %1408 = vmatpush3.bf16.xpose.msra.mxu0 %v1505_v4  ;;  %1437 = vmatprep.subr.bf16.mxu1 %v1520_v60 }
  0x2a   : > { %1409 = vmatprep.subr.bf16.mxu0 %v1506_v5 }
  0x2c   : > { %1438 = vmatpush3.bf16.msra.mxu1 %v1520_v60 }
  0x2d   : > { %1439 = vmatprep.subr.bf16.mxu1 %v1521_v62 }
  0x30   : > { %1440 = vmatpush3.bf16.msra.mxu1 %v1521_v62 }
  0x31   : > { %1410 = vmatpush3.bf16.xpose.msra.mxu0 %v1506_v5 }
  0x32   : > { %1411 = vmatprep.subr.bf16.mxu0 %v1507_v6 }
  0x39   : > { %1412 = vmatpush3.bf16.xpose.msra.mxu0 %v1507_v6 }
  0x3a   : > { %1413 = vmatprep.subr.bf16.mxu0 %v1508_v7 }
  0x41   : > { %1414 = vmatpush3.bf16.xpose.msra.mxu0 %v1508_v7 }
  0x42   : > { %1415 = vmatprep.subr.bf16.mxu0 %v1509_v8 }
  0x49   : > { %1416 = vmatpush3.bf16.xpose.msra.mxu0 %v1509_v8 }
  0x50   : > { %1418 = vmatmul.mubr.bf16.vlgmr.msra.gmra.mxu0 %v1511_v9 }
  0x51   : > { %1421 = vmatprep.mubr.bf16.mxu0 %v1512_v10 }
  0x58   : > { %1422 = vmatmul.mubr.bf16.gmra.mxu0 %v1513_v11 }
 0x110   : > { %v1681_v13 = vpop.f32.mrf.mxu0 }
 0x111   : > { %548 = vmax.xlane.f32.xlu1 %v1681_v13 }
 0x112   : > { %v1684_v14 = vpop.f32.mrf.mxu0 }
 0x113   : > { %544 = vmax.xlane.f32.xlu0 %v1684_v14 }
 0x114   : > { %v1687_v15 = vpop.f32.mrf.mxu0 }
 0x115   : > { %550 = vmax.xlane.f32.xlu1 %v1687_v15 }
 0x116   : > { %v1690_v16 = vpop.f32.mrf.mxu0 }
 0x117   : > { %546 = vmax.xlane.f32.xlu0 %v1690_v16 }
 0x118   : > { %v1693_v17 = vpop.f32.mrf.mxu0 }
 0x11a   : > { %v1695_v18 = vpop.f32.mrf.mxu0 }
 0x11b   : > { %552 = vmax.xlane.f32.xlu0 %v1695_v18 }
 0x11c   : > { %v1698_v19 = vpop.f32.mrf.mxu0 }
 0x11e   : > { %v1700_v21 = vpop.f32.mrf.mxu0 }
 0x11f   : > { %556 = vmax.xlane.f32.xlu0 %v1693_v17  ;;  %554 = vmax.xlane.f32.xlu1 %v1700_v21 }
 0x123   : > { %558 = vmax.xlane.f32.xlu1 %v1698_v19 }
 0x19a   : > { %v549_v26 = vpop.xlane.xlu1 %548 }
 0x19b   : > { %v1727_v28 = vmax.f32 %v1721_v24, %v549_v26 }
 0x19c   : > { %v545_v29 = vpop.xlane.xlu0 %544 }
 0x19d   : > { %v570_v31 = vsub.f32 %v1721_v24, %v1727_v28  ;;  %896 = vst.msk [vmem:[#allocation2 + $0x10] sm:$0xff] %vm334_vm0, %v1727_v28  ;;  %v1736_v32 = vmax.f32 %v1724_v27, %v545_v29  ;;  %604 = vperm.xlu1 %1501, %v1727_v28  }
 0x19e   : > { %v551_v34 = vpop.xlane.xlu1 %550 }
 0x19f   : > { %v568_v36 = vsub.f32 %v1724_v27, %v1736_v32  ;;  %894 = vst.msk [vmem:[#allocation2] sm:$0xff] %vm334_vm0, %v1736_v32  ;;  %v1747_v37 = vmax.f32 %v1729_v30, %v551_v34  ;;  %594 = vperm.xlu0 %1500, %v1736_v32   ;;  %v580_v60 = vmul.f32 1.442695, %v570_v31 }
 0x1a0   : > { %v547_v38 = vpop.xlane.xlu0 %546 }
 0x1a1   : > { %v571_v39 = vsub.f32 %v1729_v30, %v1747_v37  ;;  %897 = vst.msk [vmem:[#allocation2 + $0x18] sm:$0xff] %vm334_vm0, %v1747_v37  ;;  %v1755_v40 = vmax.f32 %v1740_v35, %v547_v38  ;;  %609 = vperm.xlu1 %1501, %v1747_v37   ;;  %v576_v54 = vmul.f32 1.442695, %v568_v36  ;;  %v1522_v37 = vld [vmem:[%s1891_s3 + $0x38] sm:$0xff]  }
 0x1a2   : > { %1449 = vmatprep.subr.bf16.mxu1 %v1522_v37 }
 0x1a3   : > { %v569_v43 = vsub.f32 %v1740_v35, %v1755_v40  ;;  %895 = vst.msk [vmem:[#allocation2 + $0x8] sm:$0xff] %vm334_vm0, %v1755_v40  ;;  %v582_v62 = vmul.f32 1.442695, %v571_v39  ;;  %v1523_v39 = vld [vmem:[%s1891_s3 + $0x30] sm:$0xff]  }
 0x1a4   : > { %v553_v44 = vpop.xlane.xlu0 %552 }
 0x1a5   : > { %v1766_v45 = vmax.f32 %v1759_v42, %v553_v44  ;;  %599 = vperm.xlu1 %1501, %v1755_v40   ;;  %v1524_v40 = vld [vmem:[%s1891_s3 + $0x28] sm:$0xff]  }
 0x1a7   : > { %v572_v49 = vsub.f32 %v1759_v42, %v1766_v45  ;;  %898 = vst.msk [vmem:[#allocation2 + $0x20] sm:$0xff] %vm334_vm0, %v1766_v45  ;;  %v1525_v42 = vld [vmem:[%s1891_s3 + $0x20] sm:$0xff]  }
 0x1a8   : > { %v557_v50 = vpop.xlane.xlu0 %556  ;;  %v555_v51 = vpop.xlane.xlu1 %554 }
 0x1a9   : > { %v1779_v52 = vmax.f32 %v1770_v47, %v557_v50  ;;  %v1782_v53 = vmax.f32 %v1772_v48, %v555_v51  ;;  %v584_v35 = vmul.f32 1.442695, %v572_v49 }
 0x1ab   : > { %v574_v56 = vsub.f32 %v1770_v47, %v1779_v52  ;;  %900 = vst.msk [vmem:[#allocation2 + $0x30] sm:$0xff] %vm334_vm0, %v1779_v52  ;;  %v573_v57 = vsub.f32 %v1772_v48, %v1782_v53  ;;  %899 = vst.msk [vmem:[#allocation2 + $0x28] sm:$0xff] %vm334_vm0, %v1782_v53  ;;  %624 = vperm.xlu1 %1501, %v1779_v52  }
 0x1ac   : > { %v559_v58 = vpop.xlane.xlu1 %558 }
 0x1ad   : > { %v1797_v59 = vmax.f32 %v1785_v55, %v559_v58  ;;  %v586_v27 = vmul.f32 1.442695, %v573_v57  ;;  %v588_v48 = vmul.f32 1.442695, %v574_v56  ;;  %v659_v57 = vld [vmem:[#allocation3 + $0x18] sm:$0xff] }
 0x1af   : > { %v575_v61 = vsub.f32 %v1785_v55, %v1797_v59  ;;  %901 = vst.msk [vmem:[#allocation2 + $0x38] sm:$0xff] %vm334_vm0, %v1797_v59  ;;  %614 = vperm.xlu1 %1501, %v1766_v45   ;;  %v656_v45 = vld [vmem:[#allocation3] sm:$0xff] }
 0x1b3   : > { %619 = vperm.xlu1 %1501, %v1782_v53  }
 0x1b7   : > { %629 = vperm.xlu1 %1501, %v1797_v59  }
 0x218   : > { %v605_v63 = vpop.permute.xlu1 %604 }
 0x219   : > { %v634_v5 = vsub.f32 %v1681_v13, %v605_v63 }
 0x21a   : > { %v595_v0 = vpop.permute.xlu0 %594 }
 0x21b   : > { %v632_v1 = vsub.f32 %v1684_v14, %v595_v0  ;;  %v644_v9 = vmul.f32 1.442695, %v634_v5  ;;  %v657_v0 = vld [vmem:[#allocation3 + $0x8] sm:$0xff] }
 0x21c   : > { %v610_v2 = vpop.permute.xlu1 %609 }
 0x21d   : > { %v640_v3 = vmul.f32 1.442695, %v632_v1  ;;  %v635_v4 = vsub.f32 %v1687_v15, %v610_v2  ;;  %v590_v1 = vmul.f32 1.442695, %v575_v61 }
 0x21f   : > { %1530 = vpow2.f32 %v640_v3  ;;  %v646_v6 = vmul.f32 1.442695, %v635_v4 }
 0x220   : > { %v600_v7 = vpop.permute.xlu1 %599 }
 0x221   : > { %v633_v8 = vsub.f32 %v1690_v16, %v600_v7  ;;  %1532 = vpow2.f32 %v646_v6  ;;  %v658_v7 = vld [vmem:[#allocation3 + $0x10] sm:$0xff] }
 0x223   : > { %v642_v10 = vmul.f32 1.442695, %v633_v8 }
 0x225   : > { %1534 = vpow2.f32 %v642_v10 }
 0x226   : > { %1536 = vpow2.f32 %v644_v9  ;;  %v625_v11 = vpop.permute.xlu1 %624  ;;  %v660_v9 = vld [vmem:[#allocation3 + $0x20] sm:$0xff] }
 0x227   : > { %v638_v12 = vsub.f32 %v1693_v17, %v625_v11  ;;  %v662_v11 = vld [vmem:[#allocation3 + $0x30] sm:$0xff] }
 0x229   : > { %v652_v13 = vmul.f32 1.442695, %v638_v12  ;;  %v661_v12 = vld [vmem:[#allocation3 + $0x28] sm:$0xff] }
 0x22a   : > { %v615_v14 = vpop.permute.xlu1 %614 }
 0x22b   : > { %v636_v20 = vsub.f32 %v1695_v18, %v615_v14 }
 0x22c   : > { %v1531_v22 = vpop.eup %1530 }
 0x22d   : > { %v648_v15 = vmul.f32 1.442695, %v636_v20  ;;  %672 = vadd.xlane.f32.xlu1 %v1531_v22 }
 0x22e   : > { %v620_v23 = vpop.permute.xlu1 %619  ;;  %v1533_v16 = vpop.eup %1532 }
 0x22f   : > { %1538 = vpow2.f32 %v648_v15  ;;  %v637_v25 = vsub.f32 %v1700_v21, %v620_v23 }
 0x230   : > { %1540 = vpow2.f32 %v652_v13 }
 0x231   : > { %v650_v26 = vmul.f32 1.442695, %v637_v25  ;;  %678 = vadd.xlane.f32.xlu1 %v1533_v16 }
 0x232   : > { %v1535_v29 = vpop.eup %1534  ;;  %v630_v33 = vpop.permute.xlu1 %629 }
 0x233   : > { %v1537_v34 = vpop.eup %1536  ;;  %1542 = vpow2.f32 %v650_v26  ;;  %v639_v17 = vsub.f32 %v1698_v19, %v630_v33  ;;  %674 = vadd.xlane.f32.xlu0 %v1535_v29  ;;  %v761_v18 = vpack.c.bf16 %v1535_v29, %v1531_v22  ;;  %v578_v19 = vmul.f32 1.442695, %v569_v43  ;;  %v1526_v43 = vld [vmem:[%s1891_s3 + $0x18] sm:$0xff]  }
 0x234   : > { %v762_v38 = vpack.c.bf16 %v1533_v16, %v1537_v34  ;;  %v663_v16 = vld [vmem:[#allocation3 + $0x38] sm:$0xff] }
 0x235   : > { %v654_v41 = vmul.f32 1.442695, %v639_v17  ;;  %1441 = vmatprep.mubr.bf16.mxu1 %v761_v18 }
 0x236   : > { %1442 = vmatmul.mubr.bf16.vlgmr.msra.gmra.mxu1 %v762_v38 }
 0x237   : > { %1544 = vpow2.f32 %v654_v41  ;;  %676 = vadd.xlane.f32.xlu0 %v1537_v34  ;;  %1450 = vmatpush3.bf16.msra.mxu1 %v1522_v37  ;;  %v1527_v41 = vld [vmem:[%s1891_s3 + $0x10] sm:$0xff]  }
 0x238   : > { %1546 = vpow2.f32 %v578_v19  ;;  %1451 = vmatprep.subr.bf16.mxu1 %v1523_v39 }
 0x239   : > { %1548 = vpow2.f32 %v576_v54 }
 0x23a   : > { %1550 = vpow2.f32 %v580_v60  ;;  %v1529_v60 = vld [vmem:[%s1891_s3] sm:$0xff]  }
 0x23b   : > { %1552 = vpow2.f32 %v582_v62  ;;  %1452 = vmatpush3.bf16.msra.mxu1 %v1523_v39 }
 0x23c   : > { %v1539_v44 = vpop.eup %1538  ;;  %1554 = vpow2.f32 %v584_v35  ;;  %1453 = vmatprep.subr.bf16.mxu1 %v1524_v40 }
 0x23d   : > { %680 = vadd.xlane.f32.xlu0 %v1539_v44  ;;  %v1541_v21 = vpop.eup %1540  ;;  %1556 = vpow2.f32 %v586_v27 }
 0x23e   : > { %1558 = vpow2.f32 %v588_v48 }
 0x23f   : > { %1454 = vmatpush3.bf16.msra.mxu1 %v1524_v40  ;;  %1560 = vpow2.f32 %v590_v1 }
 0x240   : > { %v1543_v46 = vpop.eup %1542  ;;  %1455 = vmatprep.subr.bf16.mxu1 %v1525_v42 }
 0x241   : > { %684 = vadd.xlane.f32.xlu0 %v1541_v21  ;;  %682 = vadd.xlane.f32.xlu1 %v1543_v46  ;;  %v763_v50 = vpack.c.bf16 %v1543_v46, %v1539_v44 }
 0x243   : > { %1445 = vmatprep.mubr.bf16.mxu1 %v763_v50  ;;  %1456 = vmatpush3.bf16.msra.mxu1 %v1525_v42  ;;  %v1528_v50 = vld [vmem:[%s1891_s3 + $0x8] sm:$0xff]  }
 0x244   : > { %v1545_v51 = vpop.eup %1544  ;;  %1457 = vmatprep.subr.bf16.mxu1 %v1526_v43 }
 0x245   : > { %686 = vadd.xlane.f32.xlu1 %v1545_v51  ;;  %v764_v58 = vpack.c.bf16 %v1545_v51, %v1541_v21  ;;  %v1547_v24 = vpop.eup %1546 }
 0x246   : > { %v1549_v28 = vpop.eup %1548  ;;  %v665_v5 = vmul.f32 %v1547_v24, %v657_v0 }
 0x247   : > { %1446 = vmatmul.mubr.bf16.gmra.mxu1 %v764_v58  ;;  %v1551_v31 = vpop.eup %1550  ;;  %v664_v49 = vmul.f32 %v1549_v28, %v656_v45 }
 0x248   : > { %v1553_v32 = vpop.eup %1552  ;;  %1458 = vmatpush3.bf16.msra.mxu1 %v1526_v43  ;;  %v666_v52 = vmul.f32 %v1551_v31, %v658_v7 }
 0x249   : > { %v1555_v30 = vpop.eup %1554  ;;  %v667_v2 = vmul.f32 %v1553_v32, %v659_v57  ;;  %1459 = vmatprep.subr.bf16.mxu1 %v1527_v41 }
 0x24a   : > { %v1557_v36 = vpop.eup %1556  ;;  %v668_v59 = vmul.f32 %v1555_v30, %v660_v9 }
 0x24b   : > { %v1559_v61 = vpop.eup %1558  ;;  %v669_v15 = vmul.f32 %v1557_v36, %v661_v12 }
 0x24c   : > { %v670_v22 = vmul.f32 %v1559_v61, %v662_v11  ;;  %v1561_v13 = vpop.eup %1560  ;;  %1460 = vmatpush3.bf16.msra.mxu1 %v1527_v41 }
 0x24d   : > { %v671_v17 = vmul.f32 %v1561_v13, %v663_v16  ;;  %1461 = vmatprep.subr.bf16.mxu1 %v1528_v50 }
 0x250   : > { %1462 = vmatpush3.bf16.msra.mxu1 %v1528_v50  ;;  %v1312_v50 = vld [vmem:[%s1892_s4] ss:$0 sm:$0xff] }
 0x251   : > { %1463 = vmatprep.subr.bf16.mxu1 %v1529_v60 }
 0x254   : > { %1464 = vmatpush3.bf16.msra.mxu1 %v1529_v60 }
 0x256   : > { %720 = vperm.xlu1 %1501, %v1547_v24  }
 0x257   : > { %715 = vperm.xlu0 %1500, %v1549_v28  }
 0x25a   : > { %725 = vperm.xlu1 %1501, %v1551_v31  }
 0x25b   : > { %730 = vperm.xlu0 %1500, %v1553_v32  }
 0x25e   : > { %735 = vperm.xlu1 %1501, %v1555_v30  }
 0x25f   : > { %740 = vperm.xlu0 %1500, %v1557_v36  }
 0x2b6   : > { %v673_v53 = vpop.xlane.xlu1 %672 }
 0x2b7   : > { %v688_v63 = vadd.f32 %v673_v53, %v664_v49 }
 0x2b9   : > { %697 = vst.msk [vmem:[#allocation3] sm:$0xff] %vm334_vm0, %v688_v63 }
 0x2ba   : > { %v679_v3 = vpop.xlane.xlu1 %678 }
 0x2bb   : > { %v691_v4 = vadd.f32 %v679_v3, %v667_v2 }
 0x2bc   : > { %v675_v6 = vpop.xlane.xlu0 %674 }
 0x2bd   : > { %700 = vst.msk [vmem:[#allocation3 + $0x18] sm:$0xff] %vm334_vm0, %v691_v4  ;;  %v689_v47 = vadd.f32 %v675_v6, %v665_v5 }
 0x2bf   : > { %698 = vst.msk [vmem:[#allocation3 + $0x8] sm:$0xff] %vm334_vm0, %v689_v47 }
 0x2c0   : > { %v677_v56 = vpop.xlane.xlu0 %676  ;;  %v905_v34 = vld [vmem:[#allocation3] sm:$0xff] }
 0x2c1   : > { %v690_v8 = vadd.f32 %v677_v56, %v666_v52 }
 0x2c3   : > { %699 = vst.msk [vmem:[#allocation3 + $0x10] sm:$0xff] %vm334_vm0, %v690_v8 }
 0x2c4   : > { %v908_v55 = vld [vmem:[#allocation3 + $0x18] sm:$0xff] }
 0x2c5   : > { %1562 = vrcp.f32 %v908_v55 }
 0x2c6   : > { %v681_v10 = vpop.xlane.xlu0 %680  ;;  %v906_v14 = vld [vmem:[#allocation3 + $0x8] sm:$0xff] }
 0x2c7   : > { %v692_v20 = vadd.f32 %v681_v10, %v668_v59  ;;  %1564 = vrcp.f32 %v906_v14 }
 0x2c9   : > { %701 = vst.msk [vmem:[#allocation3 + $0x20] sm:$0xff] %vm334_vm0, %v692_v20 }
 0x2ca   : > { %v685_v23 = vpop.xlane.xlu0 %684  ;;  %v683_v25 = vpop.xlane.xlu1 %682  ;;  %v907_v26 = vld [vmem:[#allocation3 + $0x10] sm:$0xff] }
 0x2cb   : > { %v694_v29 = vadd.f32 %v685_v23, %v670_v22  ;;  %v693_v33 = vadd.f32 %v683_v25, %v669_v15  ;;  %1566 = vrcp.f32 %v907_v26 }
 0x2cc   : > { %1568 = vrcp.f32 %v905_v34 }
 0x2cd   : > { %703 = vst.msk [vmem:[#allocation3 + $0x30] sm:$0xff] %vm334_vm0, %v694_v29  ;;  %702 = vst.msk [vmem:[#allocation3 + $0x28] sm:$0xff] %vm334_vm0, %v693_v33 }
 0x2ce   : > { %v687_v18 = vpop.xlane.xlu1 %686 }
 0x2cf   : > { %v695_v38 = vadd.f32 %v687_v18, %v671_v17 }
 0x2d0   : > { %v909_v46 = vld [vmem:[#allocation3 + $0x20] sm:$0xff] }
 0x2d1   : > { %704 = vst.msk [vmem:[#allocation3 + $0x38] sm:$0xff] %vm334_vm0, %v695_v38 }
 0x2d2   : > { %v1563_v44 = vpop.eup %1562  ;;  %v716_v31 = vpop.permute.xlu0 %715 }
 0x2d3   : > { %946 = vperm.xlu0 %1500, %v1563_v44   ;;  %v721_v30 = vpop.permute.xlu1 %720  ;;  %v753_v1 = vmul.f32 0.0, %v716_v31 }
 0x2d4   : > { %v910_v21 = vld [vmem:[#allocation3 + $0x28] sm:$0xff]  ;;  %v1565_v51 = vpop.eup %1564  ;;  %v911_v58 = vld [vmem:[#allocation3 + $0x30] sm:$0xff]  ;;  %v754_v2 = vmul.f32 0.0, %v721_v30 }
 0x2d5   : > { %1570 = vrcp.f32 %v910_v21 }
 0x2d6   : > { %1572 = vrcp.f32 %v909_v46  ;;  %v731_v36 = vpop.permute.xlu0 %730 }
 0x2d7   : > { %936 = vperm.xlu0 %1500, %v1565_v51   ;;  %v726_v40 = vpop.permute.xlu1 %725  ;;  %v756_v3 = vmul.f32 0.0, %v731_v36 }
 0x2d8   : > { %v1567_v19 = vpop.eup %1566  ;;  %v912_v54 = vld [vmem:[#allocation3 + $0x38] sm:$0xff]  ;;  %v755_v57 = vmul.f32 0.0, %v726_v40 }
 0x2d9   : > { %941 = vperm.xlu1 %1501, %v1567_v19   ;;  %1574 = vrcp.f32 %v912_v54  ;;  %v1569_v62 = vpop.eup %1568 }
 0x2da   : > { %1576 = vrcp.f32 %v911_v58  ;;  %v741_v42 = vpop.permute.xlu0 %740 }
 0x2db   : > { %750 = vperm.xlu0 %1500, %v1561_v13   ;;  %v736_v49 = vpop.permute.xlu1 %735  ;;  %v758_v14 = vmul.f32 0.0, %v741_v42 }
 0x2dc   : > { %v757_v20 = vmul.f32 0.0, %v736_v49 }
 0x2dd   : > { %931 = vperm.xlu1 %1501, %v1569_v62  }
 0x2e1   : > { %745 = vperm.xlu1 %1501, %v1559_v61  }
 0x2e2   : > { %v1571_v35 = vpop.eup %1570 }
 0x2e3   : > { %956 = vperm.xlu0 %1500, %v1571_v35   ;;  %v1573_v27 = vpop.eup %1572 }
 0x2e5   : > { %951 = vperm.xlu1 %1501, %v1573_v27  }
 0x2e6   : > { %v1575_v24 = vpop.eup %1574 }
 0x2e7   : > { %966 = vperm.xlu0 %1500, %v1575_v24   ;;  %v1577_v28 = vpop.eup %1576 }
 0x2e9   : > { %961 = vperm.xlu1 %1501, %v1577_v28  }
 0x2f6   : > { %v1443_v32 = vpop.f32.mrf.mxu1 }
 0x2f7   : > { %v880_v4 = vadd.f32 %v1443_v32, %v755_v57 }
 0x2f8   : > { %v847_v37 = vpop.f32.mrf.mxu1 }
 0x2f9   : > { %v878_v5 = vadd.f32 %v847_v37, %v753_v1 }
 0x2fa   : > { %v1444_v39 = vpop.f32.mrf.mxu1 }
 0x2fb   : > { %v881_v7 = vadd.f32 %v1444_v39, %v756_v3 }
 0x2fc   : > { %v850_v43 = vpop.f32.mrf.mxu1 }
 0x2fd   : > { %v879_v6 = vadd.f32 %v850_v43, %v754_v2 }
 0x307   : > { %v1447_v48 = vpop.f32.mrf.mxu1 }
 0x309   : > { %v863_v53 = vpop.f32.mrf.mxu1 }
 0x30a   : > { %v882_v15 = vadd.f32 %v863_v53, %v757_v20 }
 0x30b   : > { %v1448_v47 = vpop.f32.mrf.mxu1 }
 0x30d   : > { %v866_v10 = vpop.f32.mrf.mxu1 }
 0x30e   : > { %v883_v13 = vadd.f32 %v866_v10, %v758_v14 }
 0x34e   : > { %v947_v45 = vpop.permute.xlu0 %946 }
 0x34f   : > { %v972_v55 = vmul.f32 %v947_v45, %v881_v7 }
 0x352   : > { %v937_v63 = vpop.permute.xlu0 %936 }
 0x353   : > { %v970_v8 = vmul.f32 %v937_v63, %v879_v6 }
 0x354   : > { %v942_v0 = vpop.permute.xlu1 %941 }
 0x355   : > { %v971_v52 = vmul.f32 %v942_v0, %v880_v4 }
 0x356   : > { %v751_v59 = vpop.permute.xlu0 %750 }
 0x357   : > { %v978_v11 = vpack.c.bf16 %v972_v55, %v971_v52  ;;  %v760_v23 = vmul.f32 0.0, %v751_v59 }
 0x358   : > { %v932_v56 = vpop.permute.xlu1 %931 }
 0x359   : > { %v969_v9 = vmul.f32 %v932_v56, %v878_v5  ;;  %v885_v17 = vadd.f32 %v1448_v47, %v760_v23 }
 0x35b   : > { %v977_v61 = vpack.c.bf16 %v970_v8, %v969_v9 }
 0x35c   : > { %v746_v12 = vpop.permute.xlu1 %745 }
 0x35d   : > { %1465 = vmatprep.mubr.bf16.mxu1 %v977_v61  ;;  %v759_v25 = vmul.f32 0.0, %v746_v12 }
 0x35e   : > { %v957_v22 = vpop.permute.xlu0 %956  ;;  %1466 = vmatmul.mubr.bf16.vlgmr.msra.gmra.mxu1 %v978_v11 }
 0x35f   : > { %v974_v26 = vmul.f32 %v957_v22, %v883_v13  ;;  %v884_v18 = vadd.f32 %v1447_v48, %v759_v25 }
 0x360   : > { %v952_v16 = vpop.permute.xlu1 %951 }
 0x361   : > { %v973_v29 = vmul.f32 %v952_v16, %v882_v15 }
 0x362   : > { %v967_v33 = vpop.permute.xlu0 %966 }
 0x363   : > { %v979_v34 = vpack.c.bf16 %v974_v26, %v973_v29  ;;  %v976_v41 = vmul.f32 %v967_v33, %v885_v17 }
 0x364   : > { %v962_v38 = vpop.permute.xlu1 %961 }
 0x365   : > { %v975_v44 = vmul.f32 %v962_v38, %v884_v18  ;;  %1469 = vmatprep.mubr.bf16.mxu1 %v979_v34 }
 0x367   : > { %v980_v21 = vpack.c.bf16 %v976_v41, %v975_v44 }
 0x369   : > { %1470 = vmatmul.mubr.bf16.gmra.mxu1 %v980_v21 }
 0x41e   : > { %v1467_v46 = vpop.f32.mrf.mxu1 }
 0x41f   : > { %v1095_v54 = vadd.f32 %v1467_v46, %v1312_v50 }
 0x420   : > { %v1086_v51 = vpop.f32.mrf.mxu1 }
 0x421   : > { %v1087_v62 = vadd.f32 %v1312_v50, %v1086_v51 }
 0x422   : > { %v1468_v19 = vpop.f32.mrf.mxu1 }
 0x423   : > { %v1098_v58 = vadd.f32 %v1468_v19, %v1312_v50 }
 0x424   : > { %v1089_v60 = vpop.f32.mrf.mxu1 }
 0x425   : > { %v1350_v35 = vpack.c.bf16 %v1098_v58, %v1095_v54  ;;  %v1090_v27 = vadd.f32 %v1312_v50, %v1089_v60 }
 0x427   : > { %1362 = vst [vmem:[%s327_s12 + $0x8] sm:$0xff] %v1350_v35   ;;  %v1345_v24 = vpack.c.bf16 %v1090_v27, %v1087_v62 }
 0x429   : > { %1346 = vst [vmem:[%s327_s12] sm:$0xff] %v1345_v24   ;;  %v1471_v28 = vpop.f32.mrf.mxu1 }
 0x42a   : > { %v1111_v30 = vadd.f32 %v1471_v28, %v1312_v50 }
 0x42b   : > { %v1102_v31 = vpop.f32.mrf.mxu1 }
 0x42c   : > { %v1103_v39 = vadd.f32 %v1312_v50, %v1102_v31 }
 0x42d   : > { %v1472_v32 = vpop.f32.mrf.mxu1 }
 0x42e   : > { %v1114_v36 = vadd.f32 %v1472_v32, %v1312_v50 }
 0x42f   : > { %v1105_v37 = vpop.f32.mrf.mxu1 }
 0x430   : > { %v1360_v40 = vpack.c.bf16 %v1114_v36, %v1111_v30  ;;  %v1106_v42 = vadd.f32 %v1312_v50, %v1105_v37 }
 0x432   : > { %1364 = vst [vmem:[%s327_s12 + $0x18] sm:$0xff] %v1360_v40   ;;  %v1355_v43 = vpack.c.bf16 %v1106_v42, %v1103_v39 }
 0x434   : > { %1363 = vst [vmem:[%s327_s12 + $0x10] sm:$0xff] %v1355_v43  }
 0x435 PF: > { %s15_s20 = sadd.s32 1, %s1600_s20   ;;  %s1894_s18 = smov %s1596_s19 }
 0x436   : > { %p12_p5 = scmp.ge.s32.totalorder %s15_s20, 6   ;;  %s1895_s19 = smov %s1897_s21 }
 0x438   :  { %14 = sbr.rel (!%p12_p5) target bundleno = 2 (0x2), region = 84 }

// kernel: cross_view_transformer_forward.7
= control target key start
LH: loop header
LB: loop body
LE: loop exit
PB: predicated region body
PF: predicated region fallthrough
CT: control target
= control target key end

     0   :  { %vm789_vm0 = vcmask 11264   ;;  %s1428_s1 = inlined_call_operand.vmem [shape: bf16[128,128], index: 1, kind: input, shape index: {}]   ;;  %s1429_s0 = inlined_call_operand.vmem [shape: bf16[256,128], index: 0, kind: input, shape index: {}]   ;;  %s1430_s3 = inlined_call_operand.vmem [shape: bf16[128,2], index: 3, kind: input, shape index: {}]   ;;  %s1431_s2 = inlined_call_operand.vmem [shape: f32[1,128], index: 2, kind: input, shape index: {}]   ;;  %s1432_s4 = inlined_call_operand.vmem [shape: f32[1,2], index: 4, kind: input, shape index: {}]   ;;  %s1433_s5 = inlined_call_operand.vmem [shape: bf16[256,2], index: 5, kind: output, shape index: {}]  }
   0x1   :  { %v1068_v0 = vld [vmem:[%s1428_s1 + $0x38] sm:$0xff]   ;;  %v1069_v1 = vld [vmem:[%s1428_s1 + $0x30] sm:$0xff]   ;;  %v1070_v2 = vld [vmem:[%s1428_s1 + $0x28] sm:$0xff]  }
   0x2   :  { %972 = vmatprep.subr.bf16.mxu0 %v1068_v0  ;;  %v1071_v3 = vld [vmem:[%s1428_s1 + $0x20] sm:$0xff]   ;;  %v1072_v5 = vld [vmem:[%s1428_s1 + $0x18] sm:$0xff]   ;;  %v1073_v6 = vld [vmem:[%s1428_s1 + $0x10] sm:$0xff]  }
   0x3   :  { %973 = vmatpush3.bf16.msra.mxu0 %v1068_v0  ;;  %v1076_v4 = vld [vmem:[%s1429_s0] sm:$0xff]   ;;  %v1074_v7 = vld [vmem:[%s1428_s1 + $0x8] sm:$0xff]   ;;  %v1092_v9 = vld [vmem:[%s1430_s3 + $0x38] sm:$0xff]  }
   0x4   :  { %974 = vmatprep.subr.bf16.mxu0 %v1069_v1  ;;  %988 = vmatprep.mubr.bf16.mxu0 %v1076_v4  ;;  %v1075_v8 = vld [vmem:[%s1428_s1] sm:$0xff]   ;;  %v1093_v10 = vld [vmem:[%s1430_s3 + $0x30] sm:$0xff]   ;;  %v1077_v11 = vld [vmem:[%s1429_s0 + $0x8] sm:$0xff]  }
   0x5   :  { %1020 = vmatprep.subr.bf16.mxu1 %v1092_v9  ;;  %v1094_v12 = vld [vmem:[%s1430_s3 + $0x28] sm:$0xff]   ;;  %v1078_v13 = vld [vmem:[%s1429_s0 + $0x10] sm:$0xff]   ;;  %v1095_v14 = vld [vmem:[%s1430_s3 + $0x20] sm:$0xff]  }
   0x6   :  { %1021 = vmatpush3.bf16.msra.mxu1 %v1092_v9  ;;  %v1096_v15 = vld [vmem:[%s1430_s3 + $0x18] sm:$0xff]   ;;  %v1080_v17 = vld [vmem:[%s1429_s0 + $0x20] sm:$0xff]   ;;  %v1081_v18 = vld [vmem:[%s1429_s0 + $0x28] sm:$0xff]  }
   0x7   :  { %975 = vmatpush3.bf16.msra.mxu0 %v1069_v1  ;;  %1022 = vmatprep.subr.bf16.mxu1 %v1093_v10  ;;  %v1079_v16 = vld [vmem:[%s1429_s0 + $0x18] sm:$0xff]   ;;  %v1082_v19 = vld [vmem:[%s1429_s0 + $0x30] sm:$0xff]   ;;  %v1084_v21 = vld [vmem:[%s1429_s0 + $0x40] sm:$0xff]  }
   0x8   :  { %976 = vmatprep.subr.bf16.mxu0 %v1070_v2  ;;  %v1083_v20 = vld [vmem:[%s1429_s0 + $0x38] sm:$0xff]   ;;  %v1085_v22 = vld [vmem:[%s1429_s0 + $0x48] sm:$0xff]   ;;  %v1086_v23 = vld [vmem:[%s1429_s0 + $0x50] sm:$0xff]  }
   0x9   :  { %v1087_v24 = vld [vmem:[%s1429_s0 + $0x58] sm:$0xff]   ;;  %v1088_v25 = vld [vmem:[%s1429_s0 + $0x60] sm:$0xff]   ;;  %v1089_v26 = vld [vmem:[%s1429_s0 + $0x68] sm:$0xff]  }
   0xa   :  { %1023 = vmatpush3.bf16.msra.mxu1 %v1093_v10  ;;  %v1090_v27 = vld [vmem:[%s1429_s0 + $0x70] sm:$0xff]   ;;  %v1091_v28 = vld [vmem:[%s1429_s0 + $0x78] sm:$0xff]   ;;  %v1098_v30 = vld [vmem:[%s1430_s3 + $0x8] sm:$0xff]  }
   0xb   :  { %977 = vmatpush3.bf16.msra.mxu0 %v1070_v2  ;;  %1024 = vmatprep.subr.bf16.mxu1 %v1094_v12  ;;  %v1097_v29 = vld [vmem:[%s1430_s3 + $0x10] sm:$0xff]   ;;  %v1099_v31 = vld [vmem:[%s1430_s3] sm:$0xff]  }
   0xc   :  { %978 = vmatprep.subr.bf16.mxu0 %v1071_v3  ;;  %v1229_v34 = vld [vmem:[%s1431_s2] ss:$0 sm:$0xff] }
   0xe   :  { %1025 = vmatpush3.bf16.msra.mxu1 %v1094_v12 }
   0xf   :  { %979 = vmatpush3.bf16.msra.mxu0 %v1071_v3  ;;  %1026 = vmatprep.subr.bf16.mxu1 %v1095_v14 }
  0x10   :  { %980 = vmatprep.subr.bf16.mxu0 %v1072_v5 }
  0x12   :  { %1027 = vmatpush3.bf16.msra.mxu1 %v1095_v14 }
  0x13   :  { %981 = vmatpush3.bf16.msra.mxu0 %v1072_v5  ;;  %1028 = vmatprep.subr.bf16.mxu1 %v1096_v15 }
  0x14   :  { %982 = vmatprep.subr.bf16.mxu0 %v1073_v6 }
  0x16   :  { %1029 = vmatpush3.bf16.msra.mxu1 %v1096_v15 }
  0x17   :  { %983 = vmatpush3.bf16.msra.mxu0 %v1073_v6  ;;  %1030 = vmatprep.subr.bf16.mxu1 %v1097_v29 }
  0x18   :  { %984 = vmatprep.subr.bf16.mxu0 %v1074_v7 }
  0x1a   :  { %1031 = vmatpush3.bf16.msra.mxu1 %v1097_v29 }
  0x1b   :  { %985 = vmatpush3.bf16.msra.mxu0 %v1074_v7  ;;  %1032 = vmatprep.subr.bf16.mxu1 %v1098_v30 }
  0x1c   :  { %986 = vmatprep.subr.bf16.mxu0 %v1075_v8 }
  0x1e   :  { %1033 = vmatpush3.bf16.msra.mxu1 %v1098_v30 }
  0x1f   :  { %987 = vmatpush3.bf16.msra.mxu0 %v1075_v8  ;;  %1034 = vmatprep.subr.bf16.mxu1 %v1099_v31 }
  0x22   :  { %989 = vmatmul.mubr.bf16.vlgmr.msra.gmra.mxu0 %v1077_v11  ;;  %1035 = vmatpush3.bf16.msra.mxu1 %v1099_v31 }
  0x23   :  { %992 = vmatprep.mubr.bf16.mxu0 %v1078_v13 }
  0x2a   :  { %993 = vmatmul.mubr.bf16.gmra.mxu0 %v1079_v16 }
  0x2b   :  { %996 = vmatprep.mubr.bf16.mxu0 %v1080_v17 }
  0x32   :  { %997 = vmatmul.mubr.bf16.gmra.mxu0 %v1081_v18 }
  0x33   :  { %1000 = vmatprep.mubr.bf16.mxu0 %v1082_v19 }
  0x3a   :  { %1001 = vmatmul.mubr.bf16.gmra.mxu0 %v1083_v20 }
  0x3b   :  { %1004 = vmatprep.mubr.bf16.mxu0 %v1084_v21 }
  0x42   :  { %1005 = vmatmul.mubr.bf16.gmra.mxu0 %v1085_v22 }
  0x43   :  { %1008 = vmatprep.mubr.bf16.mxu0 %v1086_v23 }
  0x4a   :  { %1009 = vmatmul.mubr.bf16.gmra.mxu0 %v1087_v24 }
  0x4b   :  { %1012 = vmatprep.mubr.bf16.mxu0 %v1088_v25 }
  0x52   :  { %1013 = vmatmul.mubr.bf16.gmra.mxu0 %v1089_v26 }
  0x53   :  { %1016 = vmatprep.mubr.bf16.mxu0 %v1090_v27 }
  0x5a   :  { %1017 = vmatmul.mubr.bf16.gmra.mxu0 %v1091_v28 }
  0xe2   :  { %v990_v32 = vpop.f32.mrf.mxu0 }
  0xe3   :  { %v263_v38 = vadd.f32 %v990_v32, %v1229_v34 }
  0xe4   :  { %v254_v33 = vpop.f32.mrf.mxu0 }
  0xe5   :  { %v255_v36 = vadd.f32 %v1229_v34, %v254_v33  ;;  %v383_v45 = vmax.f32 %v263_v38, 0.0 }
  0xe6   :  { %v991_v35 = vpop.f32.mrf.mxu0 }
  0xe7   :  { %v266_v37 = vadd.f32 %v991_v35, %v1229_v34  ;;  %v381_v43 = vmax.f32 %v255_v36, 0.0 }
  0xe8   :  { %v257_v39 = vpop.f32.mrf.mxu0 }
  0xe9   :  { %v258_v40 = vadd.f32 %v1229_v34, %v257_v39  ;;  %v384_v41 = vmax.f32 %v266_v37, 0.0 }
  0xea   :  { %v994_v42 = vpop.f32.mrf.mxu0 }
  0xeb   :  { %v382_v44 = vmax.f32 %v258_v40, 0.0  ;;  %v414_v48 = vpack.c.bf16 %v384_v41, %v383_v45  ;;  %v279_v52 = vadd.f32 %v994_v42, %v1229_v34 }
  0xec   :  { %v270_v46 = vpop.f32.mrf.mxu0 }
  0xed   :  { %v413_v47 = vpack.c.bf16 %v382_v44, %v381_v43  ;;  %v271_v50 = vadd.f32 %v1229_v34, %v270_v46  ;;  %v387_v59 = vmax.f32 %v279_v52, 0.0 }
  0xee   :  { %v995_v49 = vpop.f32.mrf.mxu0 }
  0xef   :  { %v282_v51 = vadd.f32 %v995_v49, %v1229_v34  ;;  %1036 = vmatprep.mubr.bf16.mxu1 %v413_v47  ;;  %v385_v57 = vmax.f32 %v271_v50, 0.0 }
  0xf0   :  { %v273_v53 = vpop.f32.mrf.mxu0  ;;  %1037 = vmatmul.mubr.bf16.vlgmr.msra.gmra.mxu1 %v414_v48 }
  0xf1   :  { %v274_v54 = vadd.f32 %v1229_v34, %v273_v53  ;;  %v388_v55 = vmax.f32 %v282_v51, 0.0 }
  0xf2   :  { %v998_v56 = vpop.f32.mrf.mxu0 }
  0xf3   :  { %v386_v58 = vmax.f32 %v274_v54, 0.0  ;;  %v416_v62 = vpack.c.bf16 %v388_v55, %v387_v59  ;;  %v295_v2 = vadd.f32 %v998_v56, %v1229_v34 }
  0xf4   :  { %v286_v60 = vpop.f32.mrf.mxu0 }
  0xf5   :  { %v415_v61 = vpack.c.bf16 %v386_v58, %v385_v57  ;;  %v287_v0 = vadd.f32 %v1229_v34, %v286_v60  ;;  %v391_v9 = vmax.f32 %v295_v2, 0.0 }
  0xf6   :  { %v999_v63 = vpop.f32.mrf.mxu0 }
  0xf7   :  { %v298_v1 = vadd.f32 %v999_v63, %v1229_v34  ;;  %1040 = vmatprep.mubr.bf16.mxu1 %v415_v61  ;;  %v389_v7 = vmax.f32 %v287_v0, 0.0 }
  0xf8   :  { %v289_v3 = vpop.f32.mrf.mxu0  ;;  %1041 = vmatmul.mubr.bf16.gmra.mxu1 %v416_v62 }
  0xf9   :  { %v290_v4 = vadd.f32 %v1229_v34, %v289_v3  ;;  %v392_v5 = vmax.f32 %v298_v1, 0.0 }
  0xfa   :  { %v1002_v6 = vpop.f32.mrf.mxu0 }
  0xfb   :  { %v390_v8 = vmax.f32 %v290_v4, 0.0  ;;  %v418_v12 = vpack.c.bf16 %v392_v5, %v391_v9  ;;  %v311_v16 = vadd.f32 %v1002_v6, %v1229_v34 }
  0xfc   :  { %v302_v10 = vpop.f32.mrf.mxu0 }
  0xfd   :  { %v417_v11 = vpack.c.bf16 %v390_v8, %v389_v7  ;;  %v303_v14 = vadd.f32 %v1229_v34, %v302_v10  ;;  %v395_v23 = vmax.f32 %v311_v16, 0.0 }
  0xfe   :  { %v1003_v13 = vpop.f32.mrf.mxu0 }
  0xff   :  { %v314_v15 = vadd.f32 %v1003_v13, %v1229_v34  ;;  %1044 = vmatprep.mubr.bf16.mxu1 %v417_v11  ;;  %v393_v21 = vmax.f32 %v303_v14, 0.0 }
 0x100   :  { %v305_v17 = vpop.f32.mrf.mxu0  ;;  %1045 = vmatmul.mubr.bf16.gmra.mxu1 %v418_v12 }
 0x101   :  { %v306_v18 = vadd.f32 %v1229_v34, %v305_v17  ;;  %v396_v19 = vmax.f32 %v314_v15, 0.0 }
 0x102   :  { %v1006_v20 = vpop.f32.mrf.mxu0 }
 0x103   :  { %v394_v22 = vmax.f32 %v306_v18, 0.0  ;;  %v420_v26 = vpack.c.bf16 %v396_v19, %v395_v23  ;;  %v327_v30 = vadd.f32 %v1006_v20, %v1229_v34  ;;  %v1266_v18 = vld [vmem:[%s1432_s4] ss:$0 sm:$0xff] }
 0x104   :  { %v318_v24 = vpop.f32.mrf.mxu0 }
 0x105   :  { %v419_v25 = vpack.c.bf16 %v394_v22, %v393_v21  ;;  %v319_v28 = vadd.f32 %v1229_v34, %v318_v24  ;;  %v399_v38 = vmax.f32 %v327_v30, 0.0 }
 0x106   :  { %v1007_v27 = vpop.f32.mrf.mxu0 }
 0x107   :  { %v330_v29 = vadd.f32 %v1007_v27, %v1229_v34  ;;  %1048 = vmatprep.mubr.bf16.mxu1 %v419_v25  ;;  %v397_v36 = vmax.f32 %v319_v28, 0.0 }
 0x108   :  { %v321_v31 = vpop.f32.mrf.mxu0  ;;  %1049 = vmatmul.mubr.bf16.gmra.mxu1 %v420_v26 }
 0x109   :  { %v322_v32 = vadd.f32 %v1229_v34, %v321_v31  ;;  %v400_v33 = vmax.f32 %v330_v29, 0.0 }
 0x10a   :  { %v1010_v35 = vpop.f32.mrf.mxu0 }
 0x10b   :  { %v398_v37 = vmax.f32 %v322_v32, 0.0  ;;  %v422_v41 = vpack.c.bf16 %v400_v33, %v399_v38  ;;  %v343_v45 = vadd.f32 %v1010_v35, %v1229_v34 }
 0x10c   :  { %v334_v39 = vpop.f32.mrf.mxu0 }
 0x10d   :  { %v421_v40 = vpack.c.bf16 %v398_v37, %v397_v36  ;;  %v335_v43 = vadd.f32 %v1229_v34, %v334_v39  ;;  %v403_v52 = vmax.f32 %v343_v45, 0.0 }
 0x10e   :  { %v1011_v42 = vpop.f32.mrf.mxu0 }
 0x10f   :  { %v346_v44 = vadd.f32 %v1011_v42, %v1229_v34  ;;  %1052 = vmatprep.mubr.bf16.mxu1 %v421_v40  ;;  %v401_v50 = vmax.f32 %v335_v43, 0.0 }
 0x110   :  { %v337_v46 = vpop.f32.mrf.mxu0  ;;  %1053 = vmatmul.mubr.bf16.gmra.mxu1 %v422_v41 }
 0x111   :  { %v338_v47 = vadd.f32 %v1229_v34, %v337_v46  ;;  %v404_v48 = vmax.f32 %v346_v44, 0.0 }
 0x112   :  { %v1014_v49 = vpop.f32.mrf.mxu0 }
 0x113   :  { %v402_v51 = vmax.f32 %v338_v47, 0.0  ;;  %v424_v55 = vpack.c.bf16 %v404_v48, %v403_v52  ;;  %v359_v59 = vadd.f32 %v1014_v49, %v1229_v34 }
 0x114   :  { %v350_v53 = vpop.f32.mrf.mxu0 }
 0x115   :  { %v423_v54 = vpack.c.bf16 %v402_v51, %v401_v50  ;;  %v351_v57 = vadd.f32 %v1229_v34, %v350_v53  ;;  %v407_v2 = vmax.f32 %v359_v59, 0.0 }
 0x116   :  { %v1015_v56 = vpop.f32.mrf.mxu0 }
 0x117   :  { %v362_v58 = vadd.f32 %v1015_v56, %v1229_v34  ;;  %1056 = vmatprep.mubr.bf16.mxu1 %v423_v54  ;;  %v405_v0 = vmax.f32 %v351_v57, 0.0 }
 0x118   :  { %v353_v60 = vpop.f32.mrf.mxu0  ;;  %1057 = vmatmul.mubr.bf16.gmra.mxu1 %v424_v55 }
 0x119   :  { %v354_v61 = vadd.f32 %v1229_v34, %v353_v60  ;;  %v408_v62 = vmax.f32 %v362_v58, 0.0 }
 0x11a   :  { %v1018_v63 = vpop.f32.mrf.mxu0 }
 0x11b   :  { %v406_v1 = vmax.f32 %v354_v61, 0.0  ;;  %v426_v5 = vpack.c.bf16 %v408_v62, %v407_v2  ;;  %v375_v9 = vadd.f32 %v1018_v63, %v1229_v34 }
 0x11c   :  { %v366_v3 = vpop.f32.mrf.mxu0 }
 0x11d   :  { %v425_v4 = vpack.c.bf16 %v406_v1, %v405_v0  ;;  %v367_v7 = vadd.f32 %v1229_v34, %v366_v3  ;;  %v411_v15 = vmax.f32 %v375_v9, 0.0 }
 0x11e   :  { %v1019_v6 = vpop.f32.mrf.mxu0 }
 0x11f   :  { %v378_v8 = vadd.f32 %v1019_v6, %v1229_v34  ;;  %1060 = vmatprep.mubr.bf16.mxu1 %v425_v4  ;;  %v409_v13 = vmax.f32 %v367_v7, 0.0 }
 0x120   :  { %v369_v10 = vpop.f32.mrf.mxu0  ;;  %1061 = vmatmul.mubr.bf16.gmra.mxu1 %v426_v5 }
 0x121   :  { %v370_v11 = vadd.f32 %v1229_v34, %v369_v10  ;;  %v412_v12 = vmax.f32 %v378_v8, 0.0 }
 0x123   :  { %v410_v14 = vmax.f32 %v370_v11, 0.0  ;;  %v428_v17 = vpack.c.bf16 %v412_v12, %v411_v15 }
 0x125   :  { %v427_v16 = vpack.c.bf16 %v410_v14, %v409_v13 }
 0x127   :  { %1064 = vmatprep.mubr.bf16.mxu1 %v427_v16 }
 0x128   :  { %1065 = vmatmul.mubr.bf16.gmra.mxu1 %v428_v17 }
 0x1b0   :  { %v1038_v19 = vpop.f32.mrf.mxu1 }
 0x1b1   :  { %v543_v20 = vadd.f32 %v1038_v19, %v1266_v18 }
 0x1b2   :  { %v534_v21 = vpop.f32.mrf.mxu1 }
 0x1b3   :  { %v894_v22 = vpack.c.bf16 %v543_v20, %v543_v20  ;;  %v535_v34 = vadd.f32 %v1266_v18, %v534_v21 }
 0x1b4   :  { %v1039_v23 = vpop.f32.mrf.mxu1 }
 0x1b5   :  { %792 = vst.msk [vmem:[%s1433_s5 + $0x8] sm:$0xf] %vm789_vm0, %v894_v22  ;;  %v892_v24 = vpack.c.bf16 %v535_v34, %v535_v34  ;;  %v546_v25 = vadd.f32 %v1039_v23, %v1266_v18 }
 0x1b6   :  { %v537_v26 = vpop.f32.mrf.mxu1 }
 0x1b7   :  { %790 = vst.msk [vmem:[%s1433_s5] sm:$0xf] %vm789_vm0, %v892_v24  ;;  %v895_v27 = vpack.c.bf16 %v546_v25, %v546_v25  ;;  %v538_v28 = vadd.f32 %v1266_v18, %v537_v26 }
 0x1b8   :  { %v1042_v29 = vpop.f32.mrf.mxu1 }
 0x1b9   :  { %793 = vst.msk [vmem:[%s1433_s5 + $0xc] sm:$0xf] %vm789_vm0, %v895_v27  ;;  %v893_v30 = vpack.c.bf16 %v538_v28, %v538_v28  ;;  %v559_v31 = vadd.f32 %v1042_v29, %v1266_v18 }
 0x1ba   :  { %v550_v32 = vpop.f32.mrf.mxu1 }
 0x1bb   :  { %791 = vst.msk [vmem:[%s1433_s5 + $0x4] sm:$0xf] %vm789_vm0, %v893_v30  ;;  %v898_v33 = vpack.c.bf16 %v559_v31, %v559_v31  ;;  %v551_v35 = vadd.f32 %v1266_v18, %v550_v32 }
 0x1bc   :  { %v1043_v36 = vpop.f32.mrf.mxu1 }
 0x1bd   :  { %796 = vst.msk [vmem:[%s1433_s5 + $0x18] sm:$0xf] %vm789_vm0, %v898_v33  ;;  %v896_v37 = vpack.c.bf16 %v551_v35, %v551_v35  ;;  %v562_v38 = vadd.f32 %v1043_v36, %v1266_v18 }
 0x1be   :  { %v553_v39 = vpop.f32.mrf.mxu1 }
 0x1bf   :  { %794 = vst.msk [vmem:[%s1433_s5 + $0x10] sm:$0xf] %vm789_vm0, %v896_v37  ;;  %v899_v40 = vpack.c.bf16 %v562_v38, %v562_v38  ;;  %v554_v41 = vadd.f32 %v1266_v18, %v553_v39 }
 0x1c0   :  { %v1046_v42 = vpop.f32.mrf.mxu1 }
 0x1c1   :  { %797 = vst.msk [vmem:[%s1433_s5 + $0x1c] sm:$0xf] %vm789_vm0, %v899_v40  ;;  %v897_v43 = vpack.c.bf16 %v554_v41, %v554_v41  ;;  %v575_v44 = vadd.f32 %v1046_v42, %v1266_v18 }
 0x1c2   :  { %v566_v45 = vpop.f32.mrf.mxu1 }
 0x1c3   :  { %795 = vst.msk [vmem:[%s1433_s5 + $0x14] sm:$0xf] %vm789_vm0, %v897_v43  ;;  %v902_v46 = vpack.c.bf16 %v575_v44, %v575_v44  ;;  %v567_v47 = vadd.f32 %v1266_v18, %v566_v45 }
 0x1c4   :  { %v1047_v48 = vpop.f32.mrf.mxu1 }
 0x1c5   :  { %800 = vst.msk [vmem:[%s1433_s5 + $0x28] sm:$0xf] %vm789_vm0, %v902_v46  ;;  %v900_v49 = vpack.c.bf16 %v567_v47, %v567_v47  ;;  %v578_v50 = vadd.f32 %v1047_v48, %v1266_v18 }
 0x1c6   :  { %v569_v51 = vpop.f32.mrf.mxu1 }
 0x1c7   :  { %798 = vst.msk [vmem:[%s1433_s5 + $0x20] sm:$0xf] %vm789_vm0, %v900_v49  ;;  %v903_v52 = vpack.c.bf16 %v578_v50, %v578_v50  ;;  %v570_v53 = vadd.f32 %v1266_v18, %v569_v51 }
 0x1c8   :  { %v1050_v54 = vpop.f32.mrf.mxu1 }
 0x1c9   :  { %801 = vst.msk [vmem:[%s1433_s5 + $0x2c] sm:$0xf] %vm789_vm0, %v903_v52  ;;  %v901_v55 = vpack.c.bf16 %v570_v53, %v570_v53  ;;  %v591_v56 = vadd.f32 %v1050_v54, %v1266_v18 }
 0x1ca   :  { %v582_v57 = vpop.f32.mrf.mxu1 }
 0x1cb   :  { %799 = vst.msk [vmem:[%s1433_s5 + $0x24] sm:$0xf] %vm789_vm0, %v901_v55  ;;  %v906_v58 = vpack.c.bf16 %v591_v56, %v591_v56  ;;  %v583_v59 = vadd.f32 %v1266_v18, %v582_v57 }
 0x1cc   :  { %v1051_v60 = vpop.f32.mrf.mxu1 }
 0x1cd   :  { %804 = vst.msk [vmem:[%s1433_s5 + $0x38] sm:$0xf] %vm789_vm0, %v906_v58  ;;  %v904_v61 = vpack.c.bf16 %v583_v59, %v583_v59  ;;  %v594_v62 = vadd.f32 %v1051_v60, %v1266_v18 }
 0x1ce   :  { %v585_v63 = vpop.f32.mrf.mxu1 }
 0x1cf   :  { %802 = vst.msk [vmem:[%s1433_s5 + $0x30] sm:$0xf] %vm789_vm0, %v904_v61  ;;  %v907_v0 = vpack.c.bf16 %v594_v62, %v594_v62  ;;  %v586_v1 = vadd.f32 %v1266_v18, %v585_v63 }
 0x1d0   :  { %v1054_v2 = vpop.f32.mrf.mxu1 }
 0x1d1   :  { %805 = vst.msk [vmem:[%s1433_s5 + $0x3c] sm:$0xf] %vm789_vm0, %v907_v0  ;;  %v905_v3 = vpack.c.bf16 %v586_v1, %v586_v1  ;;  %v607_v4 = vadd.f32 %v1054_v2, %v1266_v18 }
 0x1d2   :  { %v598_v5 = vpop.f32.mrf.mxu1 }
 0x1d3   :  { %803 = vst.msk [vmem:[%s1433_s5 + $0x34] sm:$0xf] %vm789_vm0, %v905_v3  ;;  %v910_v6 = vpack.c.bf16 %v607_v4, %v607_v4  ;;  %v599_v7 = vadd.f32 %v1266_v18, %v598_v5 }
 0x1d4   :  { %v1055_v8 = vpop.f32.mrf.mxu1 }
 0x1d5   :  { %808 = vst.msk [vmem:[%s1433_s5 + $0x48] sm:$0xf] %vm789_vm0, %v910_v6  ;;  %v908_v9 = vpack.c.bf16 %v599_v7, %v599_v7  ;;  %v610_v10 = vadd.f32 %v1055_v8, %v1266_v18 }
 0x1d6   :  { %v601_v11 = vpop.f32.mrf.mxu1 }
 0x1d7   :  { %806 = vst.msk [vmem:[%s1433_s5 + $0x40] sm:$0xf] %vm789_vm0, %v908_v9  ;;  %v911_v12 = vpack.c.bf16 %v610_v10, %v610_v10  ;;  %v602_v13 = vadd.f32 %v1266_v18, %v601_v11 }
 0x1d8   :  { %v1058_v14 = vpop.f32.mrf.mxu1 }
 0x1d9   :  { %809 = vst.msk [vmem:[%s1433_s5 + $0x4c] sm:$0xf] %vm789_vm0, %v911_v12  ;;  %v909_v15 = vpack.c.bf16 %v602_v13, %v602_v13  ;;  %v623_v16 = vadd.f32 %v1058_v14, %v1266_v18 }
 0x1da   :  { %v614_v17 = vpop.f32.mrf.mxu1 }
 0x1db   :  { %807 = vst.msk [vmem:[%s1433_s5 + $0x44] sm:$0xf] %vm789_vm0, %v909_v15  ;;  %v914_v19 = vpack.c.bf16 %v623_v16, %v623_v16  ;;  %v615_v20 = vadd.f32 %v1266_v18, %v614_v17 }
 0x1dc   :  { %v1059_v21 = vpop.f32.mrf.mxu1 }
 0x1dd   :  { %812 = vst.msk [vmem:[%s1433_s5 + $0x58] sm:$0xf] %vm789_vm0, %v914_v19  ;;  %v912_v22 = vpack.c.bf16 %v615_v20, %v615_v20  ;;  %v626_v34 = vadd.f32 %v1059_v21, %v1266_v18 }
 0x1de   :  { %v617_v23 = vpop.f32.mrf.mxu1 }
 0x1df   :  { %810 = vst.msk [vmem:[%s1433_s5 + $0x50] sm:$0xf] %vm789_vm0, %v912_v22  ;;  %v915_v24 = vpack.c.bf16 %v626_v34, %v626_v34  ;;  %v618_v25 = vadd.f32 %v1266_v18, %v617_v23 }
 0x1e0   :  { %v1062_v26 = vpop.f32.mrf.mxu1 }
 0x1e1   :  { %813 = vst.msk [vmem:[%s1433_s5 + $0x5c] sm:$0xf] %vm789_vm0, %v915_v24  ;;  %v913_v27 = vpack.c.bf16 %v618_v25, %v618_v25  ;;  %v639_v28 = vadd.f32 %v1062_v26, %v1266_v18 }
 0x1e2   :  { %v630_v29 = vpop.f32.mrf.mxu1 }
 0x1e3   :  { %811 = vst.msk [vmem:[%s1433_s5 + $0x54] sm:$0xf] %vm789_vm0, %v913_v27  ;;  %v918_v30 = vpack.c.bf16 %v639_v28, %v639_v28  ;;  %v631_v31 = vadd.f32 %v1266_v18, %v630_v29 }
 0x1e4   :  { %v1063_v32 = vpop.f32.mrf.mxu1 }
 0x1e5   :  { %816 = vst.msk [vmem:[%s1433_s5 + $0x68] sm:$0xf] %vm789_vm0, %v918_v30  ;;  %v916_v33 = vpack.c.bf16 %v631_v31, %v631_v31  ;;  %v642_v35 = vadd.f32 %v1063_v32, %v1266_v18 }
 0x1e6   :  { %v633_v36 = vpop.f32.mrf.mxu1 }
 0x1e7   :  { %814 = vst.msk [vmem:[%s1433_s5 + $0x60] sm:$0xf] %vm789_vm0, %v916_v33  ;;  %v919_v37 = vpack.c.bf16 %v642_v35, %v642_v35  ;;  %v634_v38 = vadd.f32 %v1266_v18, %v633_v36 }
 0x1e8   :  { %v1066_v39 = vpop.f32.mrf.mxu1 }
 0x1e9   :  { %817 = vst.msk [vmem:[%s1433_s5 + $0x6c] sm:$0xf] %vm789_vm0, %v919_v37  ;;  %v917_v40 = vpack.c.bf16 %v634_v38, %v634_v38  ;;  %v655_v41 = vadd.f32 %v1066_v39, %v1266_v18 }
 0x1ea   :  { %v646_v42 = vpop.f32.mrf.mxu1 }
 0x1eb   :  { %815 = vst.msk [vmem:[%s1433_s5 + $0x64] sm:$0xf] %vm789_vm0, %v917_v40  ;;  %v922_v43 = vpack.c.bf16 %v655_v41, %v655_v41  ;;  %v647_v44 = vadd.f32 %v1266_v18, %v646_v42 }
 0x1ec   :  { %v1067_v45 = vpop.f32.mrf.mxu1 }
 0x1ed   :  { %820 = vst.msk [vmem:[%s1433_s5 + $0x78] sm:$0xf] %vm789_vm0, %v922_v43  ;;  %v920_v46 = vpack.c.bf16 %v647_v44, %v647_v44  ;;  %v658_v47 = vadd.f32 %v1067_v45, %v1266_v18 }
 0x1ee   :  { %v649_v48 = vpop.f32.mrf.mxu1 }
 0x1ef   :  { %818 = vst.msk [vmem:[%s1433_s5 + $0x70] sm:$0xf] %vm789_vm0, %v920_v46  ;;  %v923_v49 = vpack.c.bf16 %v658_v47, %v658_v47  ;;  %v650_v50 = vadd.f32 %v1266_v18, %v649_v48 }
 0x1f1   :  { %821 = vst.msk [vmem:[%s1433_s5 + $0x7c] sm:$0xf] %vm789_vm0, %v923_v49  ;;  %v921_v51 = vpack.c.bf16 %v650_v50, %v650_v50 }
 0x1f3   :  { %819 = vst.msk [vmem:[%s1433_s5 + $0x74] sm:$0xf] %vm789_vm0, %v921_v51 }

</bundles_post_ra>
